<compile_context>
chip_gen: v7x
topology: tpu7x:2x2x1
jax: 0.10.0
libtpu: 0.0.40
codegen_flags: <defaults>
</compile_context>

<pallas_src>
import functools

import numpy as np
import jax
import jax.numpy as jnp
from jax import lax
from jax.experimental import pallas as pl
from jax.experimental.pallas import tpu as pltpu


def _silu(v):
    return v * jax.nn.sigmoid(v)


# ----------------------------------------------------------------------------- kernel

def bottleneck_kernel(x_ref, xa_ref, w1_ref, t1_ref, w2_ref, t2_ref, o_ref,
                      xh_buf, ybuf, sem, *, add):
    """One (batch, row-block) grid step.

    x_ref  : (1, TH, W, C1)  central rows (auto-pipelined VMEM block)
    xa_ref : (N, H, W, C1)   whole input, memory_space=ANY (halo-row DMA source)
    w1_ref : (C1, c_)  bf16, BN scale folded       t1_ref : (1, c_)  f32 shift
    w2_ref : (9*c_, C2) bf16, BN scale folded      t2_ref : (1, C2) f32 shift
    o_ref  : (1, TH, W, C2)
    xh_buf : (2, W, C1) f32 scratch (top/bottom halo rows of x)
    ybuf   : ((TH+4)*W, c_) f32 scratch:
             [guard | top halo | TH central rows | bottom halo | guard]
    sem    : DMA semaphores (2,)
    """
    b = pl.program_id(0)
    r = pl.program_id(1)
    nr = pl.num_programs(1)
    _, TH, W, C1 = x_ref.shape
    H = xa_ref.shape[1]
    c_ = w1_ref.shape[1]
    C2 = o_ref.shape[3]
    Mc = TH * W                                   # flattened output rows of this block

    # ---- kick off the two halo-row DMAs.  Row indices are clamped at the image
    # border; border rows are replaced by zeros in y-space below, so the clamped
    # duplicates are never consumed.
    row0 = r * TH
    top_src = jnp.maximum(row0 - 1, 0)
    bot_src = jnp.minimum(row0 + TH, H - 1)
    cp_top = pltpu.make_async_copy(xa_ref.at[b, top_src], xh_buf.at[0], sem.at[0])
    cp_bot = pltpu.make_async_copy(xa_ref.at[b, bot_src], xh_buf.at[1], sem.at[1])
    cp_top.start()
    cp_bot.start()

    # ---- cv1 on the central rows (overlaps the halo DMAs) -----------------------
    xc = x_ref[0].reshape(Mc, C1)                                   # (Mc, C1) f32
    yc = jnp.dot(xc.astype(jnp.bfloat16), w1_ref[...],
                 preferred_element_type=jnp.float32)
    yc = _silu(yc + t1_ref[...])                                    # (Mc, c_) f32
    ybuf[pl.ds(2 * W, Mc)] = yc

    # ---- cv1 on the two halo rows -----------------------------------------------
    cp_top.wait()
    cp_bot.wait()
    xh = xh_buf[...].reshape(2 * W, C1)
    yh = jnp.dot(xh.astype(jnp.bfloat16), w1_ref[...],
                 preferred_element_type=jnp.float32)
    yh = _silu(yh + t1_ref[...])                                    # (2W, c_) f32

    # SAME padding lives in y-space (cv1 output): rows outside the image are zero.
    zrow = jnp.zeros((W, c_), jnp.float32)
    ybuf[pl.ds(0, W)] = zrow                                        # guard (only masked corner reads)
    ybuf[pl.ds(W, W)] = jnp.where(r > 0, yh[:W], 0.0)               # top halo / zero pad
    ybuf[pl.ds((TH + 2) * W, W)] = jnp.where(r < nr - 1, yh[W:], 0.0)  # bottom halo / zero pad
    ybuf[pl.ds((TH + 3) * W, W)] = zrow                             # guard

    # ---- cv2: 3x3 conv (pad=1) as a single im2col MXU matmul ---------------------
    # out[h, w] = sum_{dy,dx} y_pad[h+dy, w+dx] @ w2[(dy+1)*3 + (dx+1)]
    # Tap (dy, dx) for the central rows is ybuf[(2+dy)*W + dx : +Mc]; two hoisted
    # column masks zero the wrap across row boundaries (dx = +-1).
    ww = lax.broadcasted_iota(jnp.int32, (Mc, 1), 0) % W
    m_left = ww >= 1              # tap reads column w-1 (dx = -1)
    m_right = ww < W - 1          # tap reads column w+1 (dx = +1)

    taps = []
    for dy in (-1, 0, 1):
        for dx in (-1, 0, 1):
            t = ybuf[pl.ds((2 + dy) * W + dx, Mc)].astype(jnp.bfloat16)
            if dx < 0:
                t = jnp.where(m_left, t, 0.0)
            elif dx > 0:
                t = jnp.where(m_right, t, 0.0)
            taps.append(t)
    patches = jnp.concatenate(taps, axis=-1)                        # (Mc, 9*c_) bf16

    acc = jnp.dot(patches, w2_ref[...], preferred_element_type=jnp.float32)
    u = _silu(acc + t2_ref[...])                                    # (Mc, C2) f32

    if add:
        # Residual (c1 == c2); re-read the resident block to keep its live range short.
        u = u + x_ref[0].reshape(Mc, C1)
    o_ref[0] = u.reshape(TH, W, C2).astype(o_ref.dtype)


# ----------------------------------------------------------------------------- wrapper

def bottleneck(x, params, *, shortcut=True, row_block=None):
    """x: (N, H, W, C1) float32, NHWC."""
    N, H, W, C1 = x.shape
    w2_hwio = params["w2"]                                          # (3, 3, c_, C2)
    c_, C2 = w2_hwio.shape[2], w2_hwio.shape[3]

    # Fold BN scales into the conv weights (f32 fold, single bf16 cast).
    w1f = (params["w1"] * params["s1"]).astype(jnp.bfloat16)                    # (C1, c_)
    w2f = (w2_hwio * params["s2"].reshape(1, 1, 1, C2)).reshape(9 * c_, C2)
    w2f = w2f.astype(jnp.bfloat16)                                              # tap-major
    t1, t2 = params["t1"], params["t2"]

    add = bool(shortcut and C1 == C2)

    if row_block is None:
        row_block = 8 if H % 8 == 0 else H
    TH = row_block
    assert H % TH == 0, "row_block must divide H"
    assert W % 8 == 0, "W must be a multiple of 8 (sublane-aligned rows)"
    assert C1 % 128 == 0 and C2 % 128 == 0, "lane-dense I/O channels required"
    HB = H // TH

    kernel = functools.partial(bottleneck_kernel, add=add)
    return pl.pallas_call(
        kernel,
        out_shape=jax.ShapeDtypeStruct((N, H, W, C2), x.dtype),
        grid_spec=pltpu.PrefetchScalarGridSpec(
            num_scalar_prefetch=0,
            grid=(N, HB),
            in_specs=[
                pl.BlockSpec((1, TH, W, C1), lambda b, r: (b, r, 0, 0)),
                pl.BlockSpec(memory_space=pl.ANY),     # whole x: halo-row DMA source
                pl.BlockSpec((C1, c_), lambda b, r: (0, 0)),
                pl.BlockSpec((1, c_), lambda b, r: (0, 0)),
                pl.BlockSpec((9 * c_, C2), lambda b, r: (0, 0)),
                pl.BlockSpec((1, C2), lambda b, r: (0, 0)),
            ],
            out_specs=pl.BlockSpec((1, TH, W, C2), lambda b, r: (b, r, 0, 0)),
            scratch_shapes=[
                pltpu.VMEM((2, W, C1), jnp.float32),                # halo rows of x
                pltpu.VMEM(((TH + 4) * W, c_), jnp.float32),        # halo'd cv1 output
                pltpu.SemaphoreType.DMA((2,)),
            ],
        ),
        compiler_params=pltpu.CompilerParams(
            dimension_semantics=("parallel", "parallel")),
    )(x, x, w1f, t1, w2f, t2)


# ----------------------------------------------------------------------------- params / references

def _fold_bn(key, c, eps=1e-5):
    k1, k2, k3, k4 = jax.random.split(key, 4)
    gamma = jax.random.uniform(k1, (c,), jnp.float32, 0.5, 1.5)
    beta = 0.1 * jax.random.normal(k2, (c,), jnp.float32)
    mean = 0.1 * jax.random.normal(k3, (c,), jnp.float32)
    var = jax.random.uniform(k4, (c,), jnp.float32, 0.5, 1.5)
    scale = gamma / jnp.sqrt(var + eps)
    shift = beta - mean * scale
    return scale.reshape(1, c), shift.reshape(1, c)


def make_params(key, c1, c2, e=0.5):
    c_ = int(c2 * e)
    ks = jax.random.split(key, 4)
    w1 = 0.1 * jax.random.normal(ks[0], (c1, c_), jnp.float32)                 # 1x1: (Cin, Cout)
    w2 = (0.1 / 3.0) * jax.random.normal(ks[1], (3, 3, c_, c2), jnp.float32)   # 3x3 HWIO
    s1, t1 = _fold_bn(ks[2], c_)
    s2, t2 = _fold_bn(ks[3], c2)
    return dict(w1=w1, s1=s1, t1=t1, w2=w2, s2=s2, t2=t2)


def ref_forward_matched(x, p, shortcut=True):
    """Pure-JAX reference with the same BN folding / bf16 matmul operands as the kernel."""
    c2 = p["w2"].shape[3]
    w1f = (p["w1"] * p["s1"]).astype(jnp.bfloat16)
    w2f = (p["w2"] * p["s2"].reshape(1, 1, 1, c2)).astype(jnp.bfloat16)
    y = jnp.einsum("nhwc,cd->nhwd", x.astype(jnp.bfloat16), w1f,
                   preferred_element_type=jnp.float32)
    y = _silu(y + p["t1"])
    u = lax.conv_general_dilated(
        y.astype(jnp.bfloat16), w2f, window_strides=(1, 1), padding="SAME",
        dimension_numbers=("NHWC", "HWIO", "NHWC"),
        preferred_element_type=jnp.float32)
    u = _silu(u + p["t2"])
    add = shortcut and x.shape[-1] == u.shape[-1]
    return u + x if add else u


def ref_forward_f32(x, p, shortcut=True):
    """Literal eval-mode module semantics (conv -> BN -> SiLU) in f32."""
    y = jnp.einsum("nhwc,cd->nhwd", x, p["w1"])
    y = _silu(y * p["s1"] + p["t1"])
    u = lax.conv_general_dilated(
        y, p["w2"], window_strides=(1, 1), padding="SAME",
        dimension_numbers=("NHWC", "HWIO", "NHWC"))
    u = _silu(u * p["s2"] + p["t2"])
    add = shortcut and x.shape[-1] == u.shape[-1]
    return u + x if add else u


# ----------------------------------------------------------------------------- main

if __name__ == "__main__":
    key = jax.random.PRNGKey(0)
    kx, kp = jax.random.split(key)

    N, H, W = 2, 16, 16
    c1 = c2 = 128                      # lane-dense I/O channels (c_ = 64 stays lane-sparse)
    x = jax.random.normal(kx, (N, H, W, c1), jnp.float32)         # NHWC
    params = make_params(kp, c1, c2)

    out = jax.block_until_ready(bottleneck(x, params))            # grid (N=2, H/TH=2)

    # Tight check vs a reference with matched bf16 rounding points.
    ref_bf16 = jax.block_until_ready(ref_forward_matched(x, params))
    np.testing.assert_allclose(np.asarray(out), np.asarray(ref_bf16),
                               rtol=2e-3, atol=2e-3)
    # Loose check vs the literal f32 module semantics (guards the BN folding itself).
    ref_f32 = jax.block_until_ready(ref_forward_f32(x, params))
    np.testing.assert_allclose(np.asarray(out), np.asarray(ref_f32),
                               rtol=2e-2, atol=1e-1)

    print("KERNEL_OK")
</pallas_src>

<mosaic_0001>
module attributes {stable_mosaic.version = 11 : i64} {
  func.func @bottleneck_kernel(%arg0: i32, %arg1: i32, %arg2: memref<1x8x16x128xf32, #tpu.memory_space<vmem>>, %arg3: memref<2x16x16x128xf32, #tpu.memory_space<any>>, %arg4: memref<128x64xbf16, #tpu.memory_space<vmem>>, %arg5: memref<1x64xf32, #tpu.memory_space<vmem>>, %arg6: memref<576x128xbf16, #tpu.memory_space<vmem>>, %arg7: memref<1x128xf32, #tpu.memory_space<vmem>>, %arg8: memref<1x8x16x128xf32, #tpu.memory_space<vmem>>, %arg9: memref<2x16x128xf32, #tpu.memory_space<vmem>>, %arg10: memref<192x64xf32, #tpu.memory_space<vmem>>, %arg11: memref<2x!tpu.dma_semaphore, #tpu.memory_space<semaphore_mem>>) attributes {dimension_semantics = [#tpu.dimension_semantics<parallel>, #tpu.dimension_semantics<parallel>], iteration_bounds = array<i64: 2, 2>, scalar_prefetch = 0 : i64, scratch_operands = 3 : i64, tpu.core_type = #tpu.core_type<tc>, window_params = [{transform_indices = @transform_0, window_bounds = array<i64: 1, 8, 16, 128>}, {}, {pipeline_mode = #tpu.pipeline_mode<synchronous>, transform_indices = @transform_2, window_bounds = array<i64: 128, 64>}, {pipeline_mode = #tpu.pipeline_mode<synchronous>, transform_indices = @transform_3, window_bounds = array<i64: 1, 64>}, {pipeline_mode = #tpu.pipeline_mode<synchronous>, transform_indices = @transform_4, window_bounds = array<i64: 576, 128>}, {pipeline_mode = #tpu.pipeline_mode<synchronous>, transform_indices = @transform_5, window_bounds = array<i64: 1, 128>}, {transform_indices = @transform_6, window_bounds = array<i64: 1, 8, 16, 128>}]} {
    %c8_i32 = arith.constant 8 : i32
    %0 = arith.muli %arg1, %c8_i32 : i32
    %c1_i32 = arith.constant 1 : i32
    %1 = arith.subi %0, %c1_i32 : i32
    %c0_i32 = arith.constant 0 : i32
    %2 = arith.maxsi %1, %c0_i32 : i32
    %c8_i32_0 = arith.constant 8 : i32
    %3 = arith.addi %0, %c8_i32_0 : i32
    %c15_i32 = arith.constant 15 : i32
    %4 = arith.minsi %3, %c15_i32 : i32
    %c0_i32_1 = arith.constant 0 : i32
    %c0_i32_2 = arith.constant 0 : i32
    %c0_i32_3 = arith.constant 0 : i32
    %c0_i32_4 = arith.constant 0 : i32
    %5 = tpu.memref_slice %arg3[%arg0, %2, %c0_i32_3, %c0_i32_4] : memref<2x16x16x128xf32, #tpu.memory_space<any>> -> memref<1x1x16x128xf32, #tpu.memory_space<any>>
    %6 = tpu.memref_squeeze %5 : memref<1x1x16x128xf32, #tpu.memory_space<any>> -> memref<16x128xf32, #tpu.memory_space<any>>
    %c0_i32_5 = arith.constant 0 : i32
    %c0_i32_6 = arith.constant 0 : i32
    %7 = tpu.memref_slice %arg9[%c0_i32_1, %c0_i32_5, %c0_i32_6] : memref<2x16x128xf32, #tpu.memory_space<vmem>> -> memref<1x16x128xf32, #tpu.memory_space<vmem>>
    %8 = tpu.memref_squeeze %7 : memref<1x16x128xf32, #tpu.memory_space<vmem>> -> memref<16x128xf32, #tpu.memory_space<vmem>>
    %9 = tpu.memref_slice %arg11[%c0_i32_2] : memref<2x!tpu.dma_semaphore, #tpu.memory_space<semaphore_mem>> -> memref<1x!tpu.dma_semaphore, #tpu.memory_space<semaphore_mem>>
    %10 = tpu.memref_squeeze %9 : memref<1x!tpu.dma_semaphore, #tpu.memory_space<semaphore_mem>> -> memref<!tpu.dma_semaphore, #tpu.memory_space<semaphore_mem>>
    tpu.enqueue_dma source(%6 : memref<16x128xf32, #tpu.memory_space<any>>) target(%8 : memref<16x128xf32, #tpu.memory_space<vmem>>) target_semaphore(%10 : memref<!tpu.dma_semaphore, #tpu.memory_space<semaphore_mem>>)
    %c1_i32_7 = arith.constant 1 : i32
    %c1_i32_8 = arith.constant 1 : i32
    %c0_i32_9 = arith.constant 0 : i32
    %c0_i32_10 = arith.constant 0 : i32
    %11 = tpu.memref_slice %arg3[%arg0, %4, %c0_i32_9, %c0_i32_10] : memref<2x16x16x128xf32, #tpu.memory_space<any>> -> memref<1x1x16x128xf32, #tpu.memory_space<any>>
    %12 = tpu.memref_squeeze %11 : memref<1x1x16x128xf32, #tpu.memory_space<any>> -> memref<16x128xf32, #tpu.memory_space<any>>
    %c0_i32_11 = arith.constant 0 : i32
    %c0_i32_12 = arith.constant 0 : i32
    %13 = tpu.memref_slice %arg9[%c1_i32_7, %c0_i32_11, %c0_i32_12] : memref<2x16x128xf32, #tpu.memory_space<vmem>> -> memref<1x16x128xf32, #tpu.memory_space<vmem>>
    %14 = tpu.memref_squeeze %13 : memref<1x16x128xf32, #tpu.memory_space<vmem>> -> memref<16x128xf32, #tpu.memory_space<vmem>>
    %15 = tpu.memref_slice %arg11[%c1_i32_8] : memref<2x!tpu.dma_semaphore, #tpu.memory_space<semaphore_mem>> -> memref<1x!tpu.dma_semaphore, #tpu.memory_space<semaphore_mem>>
    %16 = tpu.memref_squeeze %15 : memref<1x!tpu.dma_semaphore, #tpu.memory_space<semaphore_mem>> -> memref<!tpu.dma_semaphore, #tpu.memory_space<semaphore_mem>>
    tpu.enqueue_dma source(%12 : memref<16x128xf32, #tpu.memory_space<any>>) target(%14 : memref<16x128xf32, #tpu.memory_space<vmem>>) target_semaphore(%16 : memref<!tpu.dma_semaphore, #tpu.memory_space<semaphore_mem>>)
    %c0 = arith.constant 0 : index
    %c0_13 = arith.constant 0 : index
    %c0_14 = arith.constant 0 : index
    %c0_15 = arith.constant 0 : index
    %17 = vector.load %arg2[%c0, %c0_13, %c0_14, %c0_15] : memref<1x8x16x128xf32, #tpu.memory_space<vmem>>, vector<1x8x16x128xf32>
    %18 = vector.shape_cast %17 : vector<1x8x16x128xf32> to vector<8x16x128xf32>
    %19 = vector.shape_cast %18 : vector<8x16x128xf32> to vector<128x128xf32>
    %20 = arith.truncf %19 : vector<128x128xf32> to vector<128x128xbf16>
    %c0_16 = arith.constant 0 : index
    %c0_17 = arith.constant 0 : index
    %21 = vector.load %arg4[%c0_16, %c0_17] : memref<128x64xbf16, #tpu.memory_space<vmem>>, vector<128x64xbf16>
    %cst = arith.constant dense<0.000000e+00> : vector<128x64xf32>
    %22 = tpu.matmul %20, %21, %cst {dimension_numbers = #tpu.dot_dimension_numbers<[1], [0], [0], [1], [0, 0, 1, 1], [], []>} : vector<128x128xbf16>, vector<128x64xbf16>, vector<128x64xf32> -> vector<128x64xf32>
    %c0_18 = arith.constant 0 : index
    %c0_19 = arith.constant 0 : index
    %23 = vector.load %arg5[%c0_18, %c0_19] : memref<1x64xf32, #tpu.memory_space<vmem>>, vector<1x64xf32>
    %24 = vector.broadcast %23 : vector<1x64xf32> to vector<128x64xf32>
    %25 = arith.addf %22, %24 : vector<128x64xf32>
    %26 = arith.negf %25 : vector<128x64xf32>
    %27 = math.exp %26 : vector<128x64xf32>
    %cst_20 = arith.constant 1.000000e+00 : f32
    %28 = vector.broadcast %cst_20 : f32 to vector<128x64xf32>
    %29 = arith.addf %28, %27 : vector<128x64xf32>
    %30 = arith.divf %28, %29 : vector<128x64xf32>
    %31 = arith.mulf %25, %30 : vector<128x64xf32>
    %c32 = arith.constant 32 : index
    %c0_21 = arith.constant 0 : index
    %32 = vector.load %arg10[%c32, %c0_21] : memref<192x64xf32, #tpu.memory_space<vmem>>, vector<128x64xf32>
    tpu.vector_store %arg10[%c32, %c0_21], %31 {strides = array<i32>} : memref<192x64xf32, #tpu.memory_space<vmem>>, vector<128x64xf32>,
    %c0_i32_22 = arith.constant 0 : i32
    %c0_i32_23 = arith.constant 0 : i32
    %c0_i32_24 = arith.constant 0 : i32
    %c0_i32_25 = arith.constant 0 : i32
    %33 = tpu.memref_slice %arg3[%arg0, %2, %c0_i32_24, %c0_i32_25] : memref<2x16x16x128xf32, #tpu.memory_space<any>> -> memref<1x1x16x128xf32, #tpu.memory_space<any>>
    %34 = tpu.memref_squeeze %33 : memref<1x1x16x128xf32, #tpu.memory_space<any>> -> memref<16x128xf32, #tpu.memory_space<any>>
    %c0_i32_26 = arith.constant 0 : i32
    %c0_i32_27 = arith.constant 0 : i32
    %35 = tpu.memref_slice %arg9[%c0_i32_22, %c0_i32_26, %c0_i32_27] : memref<2x16x128xf32, #tpu.memory_space<vmem>> -> memref<1x16x128xf32, #tpu.memory_space<vmem>>
    %36 = tpu.memref_squeeze %35 : memref<1x16x128xf32, #tpu.memory_space<vmem>> -> memref<16x128xf32, #tpu.memory_space<vmem>>
    %37 = tpu.memref_slice %arg11[%c0_i32_23] : memref<2x!tpu.dma_semaphore, #tpu.memory_space<semaphore_mem>> -> memref<1x!tpu.dma_semaphore, #tpu.memory_space<semaphore_mem>>
    %38 = tpu.memref_squeeze %37 : memref<1x!tpu.dma_semaphore, #tpu.memory_space<semaphore_mem>> -> memref<!tpu.dma_semaphore, #tpu.memory_space<semaphore_mem>>
    tpu.wait_dma2 semaphore(%38 : memref<!tpu.dma_semaphore, #tpu.memory_space<semaphore_mem>>) src(%34 : memref<16x128xf32, #tpu.memory_space<any>>) dst(%36 : memref<16x128xf32, #tpu.memory_space<vmem>>)
    %c1_i32_28 = arith.constant 1 : i32
    %c1_i32_29 = arith.constant 1 : i32
    %c0_i32_30 = arith.constant 0 : i32
    %c0_i32_31 = arith.constant 0 : i32
    %39 = tpu.memref_slice %arg3[%arg0, %4, %c0_i32_30, %c0_i32_31] : memref<2x16x16x128xf32, #tpu.memory_space<any>> -> memref<1x1x16x128xf32, #tpu.memory_space<any>>
    %40 = tpu.memref_squeeze %39 : memref<1x1x16x128xf32, #tpu.memory_space<any>> -> memref<16x128xf32, #tpu.memory_space<any>>
    %c0_i32_32 = arith.constant 0 : i32
    %c0_i32_33 = arith.constant 0 : i32
    %41 = tpu.memref_slice %arg9[%c1_i32_28, %c0_i32_32, %c0_i32_33] : memref<2x16x128xf32, #tpu.memory_space<vmem>> -> memref<1x16x128xf32, #tpu.memory_space<vmem>>
    %42 = tpu.memref_squeeze %41 : memref<1x16x128xf32, #tpu.memory_space<vmem>> -> memref<16x128xf32, #tpu.memory_space<vmem>>
    %43 = tpu.memref_slice %arg11[%c1_i32_29] : memref<2x!tpu.dma_semaphore, #tpu.memory_space<semaphore_mem>> -> memref<1x!tpu.dma_semaphore, #tpu.memory_space<semaphore_mem>>
    %44 = tpu.memref_squeeze %43 : memref<1x!tpu.dma_semaphore, #tpu.memory_space<semaphore_mem>> -> memref<!tpu.dma_semaphore, #tpu.memory_space<semaphore_mem>>
    tpu.wait_dma2 semaphore(%44 : memref<!tpu.dma_semaphore, #tpu.memory_space<semaphore_mem>>) src(%40 : memref<16x128xf32, #tpu.memory_space<any>>) dst(%42 : memref<16x128xf32, #tpu.memory_space<vmem>>)
    %c0_34 = arith.constant 0 : index
    %c0_35 = arith.constant 0 : index
    %c0_36 = arith.constant 0 : index
    %45 = vector.load %arg9[%c0_34, %c0_35, %c0_36] : memref<2x16x128xf32, #tpu.memory_space<vmem>>, vector<2x16x128xf32>
    %46 = vector.shape_cast %45 : vector<2x16x128xf32> to vector<32x128xf32>
    %47 = arith.truncf %46 : vector<32x128xf32> to vector<32x128xbf16>
    %c0_37 = arith.constant 0 : index
    %c0_38 = arith.constant 0 : index
    %48 = vector.load %arg4[%c0_37, %c0_38] : memref<128x64xbf16, #tpu.memory_space<vmem>>, vector<128x64xbf16>
    %cst_39 = arith.constant dense<0.000000e+00> : vector<32x64xf32>
    %49 = tpu.matmul %47, %48, %cst_39 {dimension_numbers = #tpu.dot_dimension_numbers<[1], [0], [0], [1], [0, 0, 1, 1], [], []>} : vector<32x128xbf16>, vector<128x64xbf16>, vector<32x64xf32> -> vector<32x64xf32>
    %c0_40 = arith.constant 0 : index
    %c0_41 = arith.constant 0 : index
    %50 = vector.load %arg5[%c0_40, %c0_41] : memref<1x64xf32, #tpu.memory_space<vmem>>, vector<1x64xf32>
    %51 = vector.broadcast %50 : vector<1x64xf32> to vector<32x64xf32>
    %52 = arith.addf %49, %51 : vector<32x64xf32>
    %53 = arith.negf %52 : vector<32x64xf32>
    %54 = math.exp %53 : vector<32x64xf32>
    %cst_42 = arith.constant 1.000000e+00 : f32
    %55 = vector.broadcast %cst_42 : f32 to vector<32x64xf32>
    %56 = arith.addf %55, %54 : vector<32x64xf32>
    %57 = arith.divf %55, %56 : vector<32x64xf32>
    %58 = arith.mulf %52, %57 : vector<32x64xf32>
    %cst_43 = arith.constant 0.000000e+00 : f32
    %59 = vector.broadcast %cst_43 : f32 to vector<16x64xf32>
    %c0_44 = arith.constant 0 : index
    %c0_45 = arith.constant 0 : index
    %60 = vector.load %arg10[%c0_44, %c0_45] : memref<192x64xf32, #tpu.memory_space<vmem>>, vector<16x64xf32>
    tpu.vector_store %arg10[%c0_44, %c0_45], %59 {strides = array<i32>} : memref<192x64xf32, #tpu.memory_space<vmem>>, vector<16x64xf32>,
    %c0_i32_46 = arith.constant 0 : i32
    %61 = arith.cmpi sgt, %arg1, %c0_i32_46 : i32
    %62 = vector.extract_strided_slice %58 {offsets = [0, 0], sizes = [16, 64], strides = [1, 1]} : vector<32x64xf32> to vector<16x64xf32>
    %cst_47 = arith.constant 0.000000e+00 : f32
    %63 = vector.broadcast %cst_47 : f32 to vector<16x64xf32>
    %64 = arith.select %61, %62, %63 : vector<16x64xf32>
    %c16 = arith.constant 16 : index
    %c0_48 = arith.constant 0 : index
    %65 = vector.load %arg10[%c16, %c0_48] : memref<192x64xf32, #tpu.memory_space<vmem>>, vector<16x64xf32>
    tpu.vector_store %arg10[%c16, %c0_48], %64 {strides = array<i32>} : memref<192x64xf32, #tpu.memory_space<vmem>>, vector<16x64xf32>,
    %c1_i32_49 = arith.constant 1 : i32
    %66 = arith.cmpi slt, %arg1, %c1_i32_49 : i32
    %67 = vector.extract_strided_slice %58 {offsets = [16, 0], sizes = [16, 64], strides = [1, 1]} : vector<32x64xf32> to vector<16x64xf32>
    %cst_50 = arith.constant 0.000000e+00 : f32
    %68 = vector.broadcast %cst_50 : f32 to vector<16x64xf32>
    %69 = arith.select %66, %67, %68 : vector<16x64xf32>
    %c160 = arith.constant 160 : index
    %c0_51 = arith.constant 0 : index
    %70 = vector.load %arg10[%c160, %c0_51] : memref<192x64xf32, #tpu.memory_space<vmem>>, vector<16x64xf32>
    tpu.vector_store %arg10[%c160, %c0_51], %69 {strides = array<i32>} : memref<192x64xf32, #tpu.memory_space<vmem>>, vector<16x64xf32>,
    %c176 = arith.constant 176 : index
    %c0_52 = arith.constant 0 : index
    %71 = vector.load %arg10[%c176, %c0_52] : memref<192x64xf32, #tpu.memory_space<vmem>>, vector<16x64xf32>
    tpu.vector_store %arg10[%c176, %c0_52], %59 {strides = array<i32>} : memref<192x64xf32, #tpu.memory_space<vmem>>, vector<16x64xf32>,
    %72 = tpu.iota {dimensions = array<i32: 0>} : vector<128x1xi32>
    %c16_i32 = arith.constant 16 : i32
    %c0_i32_53 = arith.constant 0 : i32
    %73 = arith.cmpi eq, %c16_i32, %c0_i32_53 : i32
    %c1_i32_54 = arith.constant 1 : i32
    %74 = arith.select %73, %c1_i32_54, %c16_i32 : i32
    %75 = vector.broadcast %74 : i32 to vector<128x1xi32>
    %76 = arith.remsi %72, %75 : vector<128x1xi32>
    %c0_i32_55 = arith.constant 0 : i32
    %77 = vector.broadcast %c0_i32_55 : i32 to vector<128x1xi32>
    %78 = arith.cmpi ne, %76, %77 : vector<128x1xi32>
    %c0_i32_56 = arith.constant 0 : i32
    %79 = vector.broadcast %c0_i32_56 : i32 to vector<128x1xi32>
    %80 = arith.cmpi slt, %76, %79 : vector<128x1xi32>
    %c0_i32_57 = arith.constant 0 : i32
    %81 = arith.cmpi slt, %74, %c0_i32_57 : i32
    %82 = vector.broadcast %81 : i1 to vector<128x1xi1>
    %83 = vector.broadcast %82 : vector<128x1xi1> to vector<128x1xi1>
    %84 = arith.xori %80, %83 : vector<128x1xi1>
    %85 = arith.andi %84, %78 : vector<128x1xi1>
    %86 = vector.broadcast %74 : i32 to vector<128x1xi32>
    %87 = arith.addi %76, %86 : vector<128x1xi32>
    %88 = arith.select %85, %87, %76 : vector<128x1xi1>, vector<128x1xi32>
    %c1_i32_58 = arith.constant 1 : i32
    %89 = vector.broadcast %c1_i32_58 : i32 to vector<128x1xi32>
    %90 = arith.cmpi sge, %88, %89 : vector<128x1xi32>
    %c15_i32_59 = arith.constant 15 : i32
    %91 = vector.broadcast %c15_i32_59 : i32 to vector<128x1xi32>
    %92 = arith.cmpi slt, %88, %91 : vector<128x1xi32>
    %c15 = arith.constant 15 : index
    %c0_60 = arith.constant 0 : index
    %93 = vector.load %arg10[%c15, %c0_60] : memref<192x64xf32, #tpu.memory_space<vmem>>, vector<128x64xf32>
    %94 = arith.truncf %93 : vector<128x64xf32> to vector<128x64xbf16>
    %cst_61 = arith.constant 0.000000e+00 : f32
    %95 = arith.truncf %cst_61 : f32 to bf16
    %96 = vector.shape_cast %90 : vector<128x1xi1> to vector<128x1xi1>
    %97 = vector.broadcast %96 : vector<128x1xi1> to vector<128x64xi1>
    %98 = vector.broadcast %95 : bf16 to vector<128x64xbf16>
    %99 = arith.select %97, %94, %98 : vector<128x64xi1>, vector<128x64xbf16>
    %c16_62 = arith.constant 16 : index
    %c0_63 = arith.constant 0 : index
    %100 = vector.load %arg10[%c16_62, %c0_63] : memref<192x64xf32, #tpu.memory_space<vmem>>, vector<128x64xf32>
    %101 = arith.truncf %100 : vector<128x64xf32> to vector<128x64xbf16>
    %c17 = arith.constant 17 : index
    %c0_64 = arith.constant 0 : index
    %102 = vector.load %arg10[%c17, %c0_64] : memref<192x64xf32, #tpu.memory_space<vmem>>, vector<128x64xf32>
    %103 = arith.truncf %102 : vector<128x64xf32> to vector<128x64xbf16>
    %cst_65 = arith.constant 0.000000e+00 : f32
    %104 = arith.truncf %cst_65 : f32 to bf16
    %105 = vector.shape_cast %92 : vector<128x1xi1> to vector<128x1xi1>
    %106 = vector.broadcast %105 : vector<128x1xi1> to vector<128x64xi1>
    %107 = vector.broadcast %104 : bf16 to vector<128x64xbf16>
    %108 = arith.select %106, %103, %107 : vector<128x64xi1>, vector<128x64xbf16>
    %c31 = arith.constant 31 : index
    %c0_66 = arith.constant 0 : index
    %109 = vector.load %arg10[%c31, %c0_66] : memref<192x64xf32, #tpu.memory_space<vmem>>, vector<128x64xf32>
    %110 = arith.truncf %109 : vector<128x64xf32> to vector<128x64xbf16>
    %cst_67 = arith.constant 0.000000e+00 : f32
    %111 = arith.truncf %cst_67 : f32 to bf16
    %112 = vector.shape_cast %90 : vector<128x1xi1> to vector<128x1xi1>
    %113 = vector.broadcast %112 : vector<128x1xi1> to vector<128x64xi1>
    %114 = vector.broadcast %111 : bf16 to vector<128x64xbf16>
    %115 = arith.select %113, %110, %114 : vector<128x64xi1>, vector<128x64xbf16>
    %c32_68 = arith.constant 32 : index
    %c0_69 = arith.constant 0 : index
    %116 = vector.load %arg10[%c32_68, %c0_69] : memref<192x64xf32, #tpu.memory_space<vmem>>, vector<128x64xf32>
    %117 = arith.truncf %116 : vector<128x64xf32> to vector<128x64xbf16>
    %c33 = arith.constant 33 : index
    %c0_70 = arith.constant 0 : index
    %118 = vector.load %arg10[%c33, %c0_70] : memref<192x64xf32, #tpu.memory_space<vmem>>, vector<128x64xf32>
    %119 = arith.truncf %118 : vector<128x64xf32> to vector<128x64xbf16>
    %cst_71 = arith.constant 0.000000e+00 : f32
    %120 = arith.truncf %cst_71 : f32 to bf16
    %121 = vector.shape_cast %92 : vector<128x1xi1> to vector<128x1xi1>
    %122 = vector.broadcast %121 : vector<128x1xi1> to vector<128x64xi1>
    %123 = vector.broadcast %120 : bf16 to vector<128x64xbf16>
    %124 = arith.select %122, %119, %123 : vector<128x64xi1>, vector<128x64xbf16>
    %c47 = arith.constant 47 : index
    %c0_72 = arith.constant 0 : index
    %125 = vector.load %arg10[%c47, %c0_72] : memref<192x64xf32, #tpu.memory_space<vmem>>, vector<128x64xf32>
    %126 = arith.truncf %125 : vector<128x64xf32> to vector<128x64xbf16>
    %cst_73 = arith.constant 0.000000e+00 : f32
    %127 = arith.truncf %cst_73 : f32 to bf16
    %128 = vector.shape_cast %90 : vector<128x1xi1> to vector<128x1xi1>
    %129 = vector.broadcast %128 : vector<128x1xi1> to vector<128x64xi1>
    %130 = vector.broadcast %127 : bf16 to vector<128x64xbf16>
    %131 = arith.select %129, %126, %130 : vector<128x64xi1>, vector<128x64xbf16>
    %c48 = arith.constant 48 : index
    %c0_74 = arith.constant 0 : index
    %132 = vector.load %arg10[%c48, %c0_74] : memref<192x64xf32, #tpu.memory_space<vmem>>, vector<128x64xf32>
    %133 = arith.truncf %132 : vector<128x64xf32> to vector<128x64xbf16>
    %c49 = arith.constant 49 : index
    %c0_75 = arith.constant 0 : index
    %134 = vector.load %arg10[%c49, %c0_75] : memref<192x64xf32, #tpu.memory_space<vmem>>, vector<128x64xf32>
    %135 = arith.truncf %134 : vector<128x64xf32> to vector<128x64xbf16>
    %cst_76 = arith.constant 0.000000e+00 : f32
    %136 = arith.truncf %cst_76 : f32 to bf16
    %137 = vector.shape_cast %92 : vector<128x1xi1> to vector<128x1xi1>
    %138 = vector.broadcast %137 : vector<128x1xi1> to vector<128x64xi1>
    %139 = vector.broadcast %136 : bf16 to vector<128x64xbf16>
    %140 = arith.select %138, %135, %139 : vector<128x64xi1>, vector<128x64xbf16>
    %141 = tpu.concatenate %99, %101, %108, %115, %117, %124, %131, %133, %140 in 1 : vector<128x64xbf16>, vector<128x64xbf16>, vector<128x64xbf16>, vector<128x64xbf16>, vector<128x64xbf16>, vector<128x64xbf16>, vector<128x64xbf16>, vector<128x64xbf16>, vector<128x64xbf16> -> vector<128x576xbf16>
    %c0_77 = arith.constant 0 : index
    %c0_78 = arith.constant 0 : index
    %142 = vector.load %arg6[%c0_77, %c0_78] : memref<576x128xbf16, #tpu.memory_space<vmem>>, vector<576x128xbf16>
    %cst_79 = arith.constant dense<0.000000e+00> : vector<128x128xf32>
    %143 = tpu.matmul %141, %142, %cst_79 {dimension_numbers = #tpu.dot_dimension_numbers<[1], [0], [0], [1], [0, 0, 1, 1], [], []>} : vector<128x576xbf16>, vector<576x128xbf16>, vector<128x128xf32> -> vector<128x128xf32>
    %c0_80 = arith.constant 0 : index
    %c0_81 = arith.constant 0 : index
    %144 = vector.load %arg7[%c0_80, %c0_81] : memref<1x128xf32, #tpu.memory_space<vmem>>, vector<1x128xf32>
    %145 = vector.broadcast %144 : vector<1x128xf32> to vector<128x128xf32>
    %146 = arith.addf %143, %145 : vector<128x128xf32>
    %147 = arith.negf %146 : vector<128x128xf32>
    %148 = math.exp %147 : vector<128x128xf32>
    %cst_82 = arith.constant 1.000000e+00 : f32
    %149 = vector.broadcast %cst_82 : f32 to vector<128x128xf32>
    %150 = arith.addf %149, %148 : vector<128x128xf32>
    %151 = arith.divf %149, %150 : vector<128x128xf32>
    %152 = arith.mulf %146, %151 : vector<128x128xf32>
    %c0_83 = arith.constant 0 : index
    %c0_84 = arith.constant 0 : index
    %c0_85 = arith.constant 0 : index
    %c0_86 = arith.constant 0 : index
    %153 = vector.load %arg2[%c0_83, %c0_84, %c0_85, %c0_86] : memref<1x8x16x128xf32, #tpu.memory_space<vmem>>, vector<1x8x16x128xf32>
    %154 = vector.shape_cast %153 : vector<1x8x16x128xf32> to vector<8x16x128xf32>
    %155 = vector.shape_cast %154 : vector<8x16x128xf32> to vector<128x128xf32>
    %156 = arith.addf %152, %155 : vector<128x128xf32>
    %157 = vector.shape_cast %156 : vector<128x128xf32> to vector<8x16x128xf32>
    %c0_87 = arith.constant 0 : index
    %c0_88 = arith.constant 0 : index
    %c0_89 = arith.constant 0 : index
    %c0_90 = arith.constant 0 : index
    %158 = vector.load %arg8[%c0_87, %c0_88, %c0_89, %c0_90] : memref<1x8x16x128xf32, #tpu.memory_space<vmem>>, vector<1x8x16x128xf32>
    %159 = vector.shape_cast %158 : vector<1x8x16x128xf32> to vector<8x16x128xf32>
    %160 = vector.shape_cast %157 : vector<8x16x128xf32> to vector<1x8x16x128xf32>
    tpu.vector_store %arg8[%c0_87, %c0_88, %c0_89, %c0_90], %160 {strides = array<i32>} : memref<1x8x16x128xf32, #tpu.memory_space<vmem>>, vector<1x8x16x128xf32>,
    return
  }
  func.func @transform_0(%arg0: i32, %arg1: i32) -> (i32, i32, i32, i32) {
    %c0_i32 = arith.constant 0 : i32
    %c0_i32_0 = arith.constant 0 : i32
    %c0_i32_1 = arith.constant 0 : i32
    return %arg0, %arg1, %c0_i32, %c0_i32_0 : i32, i32, i32, i32
  }
  func.func @transform_2(%arg0: i32, %arg1: i32) -> (i32, i32) {
    %c0_i32 = arith.constant 0 : i32
    %c0_i32_0 = arith.constant 0 : i32
    %c0_i32_1 = arith.constant 0 : i32
    return %c0_i32, %c0_i32_0 : i32, i32
  }
  func.func @transform_3(%arg0: i32, %arg1: i32) -> (i32, i32) {
    %c0_i32 = arith.constant 0 : i32
    %c0_i32_0 = arith.constant 0 : i32
    %c0_i32_1 = arith.constant 0 : i32
    return %c0_i32, %c0_i32_0 : i32, i32
  }
  func.func @transform_4(%arg0: i32, %arg1: i32) -> (i32, i32) {
    %c0_i32 = arith.constant 0 : i32
    %c0_i32_0 = arith.constant 0 : i32
    %c0_i32_1 = arith.constant 0 : i32
    return %c0_i32, %c0_i32_0 : i32, i32
  }
  func.func @transform_5(%arg0: i32, %arg1: i32) -> (i32, i32) {
    %c0_i32 = arith.constant 0 : i32
    %c0_i32_0 = arith.constant 0 : i32
    %c0_i32_1 = arith.constant 0 : i32
    return %c0_i32, %c0_i32_0 : i32, i32
  }
  func.func @transform_6(%arg0: i32, %arg1: i32) -> (i32, i32, i32, i32) {
    %c0_i32 = arith.constant 0 : i32
    %c0_i32_0 = arith.constant 0 : i32
    %c0_i32_1 = arith.constant 0 : i32
    return %arg0, %arg1, %c0_i32, %c0_i32_0 : i32, i32, i32, i32
  }
}

</mosaic_0001>

<bundles_post_ra>
// kernel: tpu_custom_call.1
= control target key start
LH: loop header
LB: loop body
LE: loop exit
PB: predicated region body
PF: predicated region fallthrough
CT: control target
= control target key end

     0   :  { %s4601_s0 = inlined_call_operand.hbm [shape: f32[2,16,16,128], index: 0, kind: input, shape index: {}]   ;;  %s4602_s1 = inlined_call_operand.hbm [shape: f32[2,16,16,128], index: 1, kind: input, shape index: {}]   ;;  %s4603_s2 = inlined_call_operand.vmem [shape: bf16[128,64], index: 2, kind: input, shape index: {}]   ;;  %s4604_s3 = inlined_call_operand.vmem [shape: f32[1,64], index: 3, kind: input, shape index: {}]   ;;  %s4605_s4 = inlined_call_operand.hbm [shape: bf16[576,128], index: 4, kind: input, shape index: {}]   ;;  %s4606_s5 = inlined_call_operand.vmem [shape: f32[1,128], index: 5, kind: input, shape index: {}]   ;;  %s4607_s6 = inlined_call_operand.hbm [shape: f32[2,16,16,128], index: 6, kind: output, shape index: {}]  }
   0x1   :  { %4628 = sst [smem:[#allocation28_spill]] %s4605_s4 }
   0x2   :  { %4629 = sst [smem:[#allocation29_spill]] %s4607_s6 }
   0x3   :  { %11 = vsyncpa [#allocation6], 0 }
   0x4   :  { %13 = vsyncpa [#allocation6 + $0x1], 0 }
   0x5   :  { %14 = vsyncpa [#allocation9], 0 }
   0x6   :  { %15 = vsyncpa [#allocation7], 0 }
   0x7   :  { %17 = vsyncpa [#allocation7 + $0x1], 0  ;;  %s3462_s21 = smov 0   ;;  %s3464_s22 = smov 0  }
   0x8   :  { %s3466_s23 = smov 0   ;;  %s3468_s24 = smov 0  }
   0x9   :  { %s3470_s25 = smov 0   ;;  %s3472_s26 = smov 0  }
   0xa   :  { %s3474_s27 = smov 0   ;;  %s3476_s28 = smov 0  }
   0xb LB: > { %4630 = sst [smem:[#allocation22_spill]] %s3382_s21  ;;  %s2504_s29 = sadd.s32 4294967295, %s3410_s28   ;;  %s3410_s28 = sphi %s3476_s28, %s23_s28   ;;  %s3406_s27 = sphi %s3474_s27, %s4769_s27   ;;  %s3402_s26 = sphi %s3472_s26, %s4763_s26   ;;  %s3398_s25 = sphi %s3470_s25, %s4768_s25   ;;  %s3394_s24 = sphi %s3468_s24, %s4762_s24   ;;  %s3390_s23 = sphi %s3466_s23, %s4767_s23   ;;  %s3386_s22 = sphi %s3464_s22, %s4766_s22   ;;  %s3382_s21 = sphi %s3462_s21, %s4765_s21  }
   0xc   : > { %4631 = sst [smem:[#allocation23_spill]] %s3402_s26  ;;  %s2505_s30 = sadd.s32 4294967294, %s3410_s28  }
   0xd   : > { %p57_p0 = scmp.ne.s32.totalorder %s3386_s22, %s3382_s21  ;;  %p3506_p1 = scmp.eq.s32.totalorder %s2504_s29, 0 }
   0xe   : > { %p3510_p2 = scmp.eq.s32.totalorder %s2504_s29, 3  ;;  %p173_p3 = scmp.eq.s32.totalorder %s2505_s30, 3 }
   0xf   : > { %s4632_s7 = scalar_select %p3506_p1, 1, 0 }
  0x10   : > { %s4633_s8 = scalar_select %p3510_p2, 1, 0 }
  0x11   : > { %p3516_p4 = por %p3506_p1, %p57_p0  ;;  %p2506_p5 = scmp.ge.s32.totalorder %s3410_s28, 1 }
  0x12   : > { %p3521_p6 = por %p173_p3, %p57_p0  ;;  %p180_p7 = scmp.lt.s32.totalorder %s3410_s28, 5 }
  0x13   : > { %s4634_s9 = scalar_select %p3516_p4, 1, 0 }
  0x14   : > { %s4635_s10 = scalar_select %p3521_p6, 1, 0 }
  0x15   : > { %p3526_p8 = pnand %p2506_p5, %p180_p7  ;;  %s3412_s12 = smov [#allocation8]  }
  0x16   : > { %4636 = sst [smem:[#allocation24_spill]] %s4635_s10  ;;  %s198_s13 = sshll.u32 %s3412_s12, 4  ;;  %s199_s13 = int_to_ptr.vmem [resolvable:$true] %s198_s13 }
  0x17   : > { %s4637_s11 = scalar_select %p3526_p8, 1, 0 }
  0x18   : > { %p2909_p9 = pneg %p3526_p8  ;;  %s4639_s4 = sld [smem:[#allocation28_spill]] }
  0x1a   : > { %p3534_p10 = pnand %p2909_p9, %p3506_p1 }
  0x1c   : > { %p3200_p12 = pneg %p3534_p10 }
  0x1e   : > { %s3198_s17 = scalar_lea.hbm %s4639_s4, 4608 }
  0x1f   : > { %p3199_p11 = scmp.ne.s32.totalorder %s4639_s4, %s3198_s17  ;;  %p3205_p3 = scmp.lt.u32.totalorder %s3198_s17, %s4639_s4 }
  0x21   : > { %p3201_p13 = pnand %p3200_p12, %p3199_p11 }
  0x23   : > { %p3202_p0 = pneg %p3201_p13 }
  0x25   : > { %p3207_p5 = pnand %p3205_p3, %p3202_p0 }
  0x27   : > { %3210 = shalt.err (!%p3207_p5)
}
  0x28   : > { %s3211_s30 = scalar_lea.vmem %s199_s13, 4608  ;;  %p3219_p1 = scmp.lt.s32.totalorder %s199_s13, %s199_s13 }
  0x29   : > { %p3212_p7 = scmp.ne.s32.totalorder %s199_s13, %s3211_s30  ;;  %p3220_p4 = scmp.lt.s32.totalorder %s3211_s30, %s3211_s30 }
  0x2b   : > { %p3214_p9 = pnand %p3212_p7, %p3200_p12  ;;  %p3221_p8 = por %p3220_p4, %p3219_p1 }
  0x2d   : > { %p3215_p6 = pneg %p3214_p9 }
  0x2f   : > { %p3222_p2 = pnand %p3221_p8, %p3215_p6 }
  0x31   : > { %3225 = shalt.err (!%p3222_p2)
}
  0x32   : > { %s3413_s12 = smov 64   ;;  %s3414_s15 = smov 4  }
  0x33   : > { %2912 = dma.hbm_to_vmem [thread:$0]  (!%p3534_p10), %s4639_s4, 4608, %s199_s13, [#allocation9], %s3413_s12, %s3413_s12, %s3414_s15  }
  0x34   : > { %s32_s18 = sadd.s32 1, %s3402_s26  ;;  %s35_s19 = sadd.s32 1, %s3406_s27 }
  0x35   : > { %p33_p1 = scmp.ge.s32.totalorder %s32_s18, 2  ;;  %s44_s20 = sadd.s32 1, %s3390_s23 }
  0x36   : > { %p51_p2 = scmp.ne.s32.totalorder %s3390_s23, %s3386_s22  ;;  %p52_p4 = scmp.eq.s32.totalorder %s3410_s28, 0 }
  0x37   : > { %s4771_s18 = smov (%p33_p1, %s32_s18), 0  ;;  %s4773_s19 = smov (!%p33_p1, %s35_s19), %s3406_s27 }
  0x38   : > { %4640 = sst [smem:[#allocation25_spill]] %s4771_s18  ;;  %s40_s29 = ssub.s32 %s3402_s26, %s4771_s18 }
  0x39   : > { %p37_p6 = scmp.ge.s32.totalorder %s4773_s19, 2  ;;  %p4641_p8 = scmp.ne.s32.totalorder %s4633_s8, 0 }
  0x3a   : > { %p3571_p10 = por %p52_p4, %p51_p2  ;;  %p2922_p12 = scmp.lt.s32.totalorder %s3410_s28, 4 }
  0x3b   : > { %p3567_p11 = por %p4641_p8, %p51_p2  ;;  %s4775_s19 = smov (%p37_p6, %s4773_s19), 0 }
  0x3c   : > { %4645 = sst [smem:[#allocation27_spill]] %s4775_s19  ;;  %s215_s30 = sand.u32 1, %s3390_s23  }
  0x3d   : > { %s4642_s14 = scalar_select %p3567_p11, 1, 0 }
  0x3e   : > { %s2649_s12 = sshll.u32 %s3402_s26, 4  ;;  %s39_s15 = ssub.s32 %s3406_s27, %s4775_s19 }
  0x3f   : > { %4643 = sst [smem:[#allocation26_spill]] %s4642_s14  ;;  %s41_s16 = sor.u32 %s40_s29, %s39_s15 }
  0x40   : > { %s2509_s17 = sshll.u32 %s215_s30, 7  ;;  %p42_p13 = scmp.eq.s32.totalorder %s41_s16, 0 }
  0x41   : > { %s2512_s8 = sshll.u32 %s3406_s27, 5  ;;  %s219_s4 = scalar_lea.vmem [#allocation5], %s2509_s17 }
  0x42   : > { %s229_s18 = sshll.u32 %s219_s4, 4  ;;  %s226_s21 = sadd.s32 %s2649_s12, %s2512_s8  ;;  %s3586_s18 = int_to_ptr.vmem [resolvable:$true] %s229_s18 }
  0x43   : > { %s3584_s10 = scalar_select %p42_p13, %s3390_s23, %s44_s20  }
  0x44   : > { %s2513_s6 = sshll.u32 %s226_s21, 7  ;;  %p3592_p0 = pnand %p2922_p12, %p3571_p10 }
  0x45   : > { %s3599_s29 = scalar_lea.hbm %s4601_s0, %s2513_s6  ;;  %s3601_s4 = scalar_lea.sflag [#allocation6], %s215_s30 }
  0x46   : > { %s3226_s21 = scalar_lea.hbm %s3599_s29, 2048  ;;  %p3228_p5 = pneg %p3592_p0 }
  0x47   : > { %p3227_p3 = scmp.ne.s32.totalorder %s3599_s29, %s3226_s21  ;;  %s3231_s19 = scalar_lea.hbm %s4601_s0, 8192 }
  0x48   : > { %p3232_p1 = scmp.lt.u32.totalorder %s3599_s29, %s4601_s0  ;;  %p3233_p2 = scmp.lt.u32.totalorder %s3231_s19, %s3226_s21 }
  0x49   : > { %p3229_p7 = pnand %p3228_p5, %p3227_p3  ;;  %p3235_p6 = scmp.lt.u32.totalorder %s3226_s21, %s3599_s29 }
  0x4a   : > { %p3234_p4 = por %p3233_p2, %p3232_p1 }
  0x4b   : > { %p3230_p9 = pneg %p3229_p7 }
  0x4c   : > { %p3236_p8 = por %p3235_p6, %p3234_p4 }
  0x4e   : > { %p3237_p10 = pnand %p3236_p8, %p3230_p9 }
  0x50   : > { %3240 = shalt.err (!%p3237_p10)
}
  0x51   : > { %s3241_s30 = scalar_lea.vmem %s3586_s18, 2048  ;;  %s3415_s12 = smov [#allocation5]  }
  0x52   : > { %p3242_p12 = scmp.ne.s32.totalorder %s3586_s18, %s3241_s30  ;;  %s3246_s15 = sshll.u32 %s3415_s12, 4  ;;  %s3247_s15 = int_to_ptr.vmem [resolvable:$false] %s3246_s15 }
  0x53   : > { %s3248_s16 = scalar_lea.vmem %s3247_s15, 4096  ;;  %p3249_p7 = scmp.lt.s32.totalorder %s3586_s18, %s3247_s15 }
  0x54   : > { %p3244_p13 = pnand %p3242_p12, %p3228_p5  ;;  %p3250_p1 = scmp.lt.s32.totalorder %s3248_s16, %s3241_s30 }
  0x56   : > { %p3245_p3 = pneg %p3244_p13  ;;  %p3251_p2 = por %p3250_p1, %p3249_p7 }
  0x58   : > { %p3252_p4 = pnand %p3251_p2, %p3245_p3 }
  0x5a   : > { %3255 = shalt.err (!%p3252_p4)
}
  0x5b   : > { %s3416_s17 = smov 128   ;;  %s3417_s8 = smov 8  }
  0x5c   : > { %2916 = dma.hbm_to_vmem [thread:$0]  (!%p3592_p0), %s3599_s29, 2048, %s3586_s18, %s3601_s4, %s3416_s17, %s3416_s17, %s3417_s8  }
  0x5d   : > { %p4647_p5 = scmp.ne.s32.totalorder %s4637_s11, 0 }
  0x5e   : > { %s3632_s21 = sand.u32 (!%p4647_p5), 1, %s3386_s22   ;;  %p4648_p9 = scmp.ne.s32.totalorder (!%p4647_p5), %s4634_s9, 0 }
  0x5f   : > { %241 = sbr.rel (%p4647_p5) target bundleno = 1172 (0x494), region = 40  ;;  %s4620_s20 = sshll.u32 (!%p4647_p5), %s3632_s21, 7 }
  0x60   : > { %s244_s26 = scalar_lea.sflag (!%p4647_p5), [#allocation6], %s3632_s21  ;;  %s3638_s19 = scalar_lea.vmem (!%p4647_p5), [#allocation5], %s4620_s20 }
  0x66   : > { %3365 = dma.done.wait (%p4648_p9), %s244_s26, 2048  }
  0x67   : > { %3367 = vsyncadd (%p4648_p9), %s244_s26, 4294965248  ;;  %p4649_p0 = scmp.ne.s32.totalorder %s4632_s7, 0 }
  0x69   : > { %3369 = dma.done.wait (%p4649_p0), [#allocation9], 4608  }
  0x6a   : > { %3371 = vsyncadd (%p4649_p0), [#allocation9], 4294962688  ;;  %v3002_v0 = vld [vmem:[%s4603_s2] sm:$0xff]   ;;  %v3003_v1 = vld [vmem:[%s4603_s2 + $0x8] sm:$0xff]   ;;  %s2518_s11 = sshll.u32 %s3394_s24, 3  ;;  %s2521_s9 = sshll.u32 %s3398_s25, 8 }
  0x6b   : > { %2817 = vmatprep.subr.bf16.mxu0 %v3002_v0  ;;  %v3004_v2 = vld [vmem:[%s4603_s2 + $0x10] sm:$0xff]   ;;  %v3005_v3 = vld [vmem:[%s4603_s2 + $0x18] sm:$0xff]   ;;  %v323_v4 = vld [vmem:[%s3638_s19] sm:$0xff]  ;;  %s2519_s18 = sadd.s32 4294967295, %s2518_s11  ;;  %s287_s14 = sadd.s32 8, %s2518_s11 }
  0x6c   : > { %2818 = vmatpush3.bf16.msra.mxu0 %v3002_v0  ;;  %v324_v5 = vld [vmem:[%s3638_s19 + $0x8] sm:$0xff]  ;;  %v3006_v7 = vld [vmem:[%s4603_s2 + $0x20] sm:$0xff]   ;;  %v3008_v9 = vld [vmem:[%s4603_s2 + $0x30] sm:$0xff]   ;;  %p285_p6 = scmp.gt.s32.totalorder %s2519_s18, 0  ;;  %p288_p8 = scmp.lt.s32.totalorder %s287_s14, 15 }
  0x6d   : > { %2819 = vmatprep.subr.bf16.mxu0 %v3003_v1  ;;  %v339_v6 = vpack.c.bf16 %v324_v5, %v323_v4  ;;  %v3007_v8 = vld [vmem:[%s4603_s2 + $0x28] sm:$0xff]   ;;  %v3009_v10 = vld [vmem:[%s4603_s2 + $0x38] sm:$0xff]   ;;  %v325_v11 = vld [vmem:[%s3638_s19 + $0x10] sm:$0xff]  ;;  %s3418_s6 = smov [#allocation2]   ;;  %s3258_s26 = scalar_lea.hbm %s4602_s1, 8192 }
  0x6e   : > { %v326_v12 = vld [vmem:[%s3638_s19 + $0x18] sm:$0xff]  ;;  %v327_v13 = vld [vmem:[%s3638_s19 + $0x20] sm:$0xff]  ;;  %v328_v14 = vld [vmem:[%s3638_s19 + $0x28] sm:$0xff]  ;;  %s4777_s18 = smov (!%p285_p6, %s2519_s18), 0  ;;  %s4779_s14 = smov (!%p288_p8, %s287_s14), 15 }
  0x6f   : > { %2833 = vmatprep.mubr.bf16.mxu0 %v339_v6  ;;  %v340_v15 = vpack.c.bf16 %v326_v12, %v325_v11  ;;  %v341_v16 = vpack.c.bf16 %v328_v14, %v327_v13  ;;  %v329_v17 = vld [vmem:[%s3638_s19 + $0x30] sm:$0xff]  ;;  %v330_v18 = vld [vmem:[%s3638_s19 + $0x38] sm:$0xff]  ;;  %v331_v19 = vld [vmem:[%s3638_s19 + $0x40] sm:$0xff]  ;;  %s2520_s29 = sshll.u32 %s4777_s18, 4  ;;  %s302_s13 = sshll.u32 %s3418_s6, 4  ;;  %s3695_s13 = int_to_ptr.vmem [resolvable:$true] %s302_s13 }
  0x70   : > { %2820 = vmatpush3.bf16.msra.mxu0 %v3003_v1  ;;  %v332_v20 = vld [vmem:[%s3638_s19 + $0x48] sm:$0xff]  ;;  %v342_v21 = vpack.c.bf16 %v330_v18, %v329_v17  ;;  %v333_v23 = vld [vmem:[%s3638_s19 + $0x50] sm:$0xff]  ;;  %v334_v24 = vld [vmem:[%s3638_s19 + $0x58] sm:$0xff]  ;;  %s292_s4 = sadd.s32 %s2521_s9, %s2520_s29 }
  0x71   : > { %2821 = vmatprep.subr.bf16.mxu0 %v3004_v2  ;;  %v343_v22 = vpack.c.bf16 %v332_v20, %v331_v19  ;;  %v335_v25 = vld [vmem:[%s3638_s19 + $0x60] sm:$0xff]  ;;  %v336_v26 = vld [vmem:[%s3638_s19 + $0x68] sm:$0xff]  ;;  %v344_v27 = vpack.c.bf16 %v334_v24, %v333_v23  ;;  %v337_v29 = vld [vmem:[%s3638_s19 + $0x70] sm:$0xff]  ;;  %s2522_s7 = sshll.u32 %s292_s4, 4 }
  0x72   : > { %v345_v28 = vpack.c.bf16 %v336_v26, %v335_v25  ;;  %v338_v30 = vld [vmem:[%s3638_s19 + $0x78] sm:$0xff]  ;;  %s294_s15 = scalar_lea.hbm %s4602_s1, %s2522_s7 }
  0x73   : > { %v346_v31 = vpack.c.bf16 %v338_v30, %v337_v29  ;;  %s3256_s16 = scalar_lea.hbm %s294_s15, 256  ;;  %p3259_p12 = scmp.lt.u32.totalorder %s294_s15, %s4602_s1 }
  0x74   : > { %2822 = vmatpush3.bf16.msra.mxu0 %v3004_v2  ;;  %p3257_p10 = scmp.ne.s32.totalorder %s294_s15, %s3256_s16  ;;  %p3260_p13 = scmp.lt.u32.totalorder %s3258_s26, %s3256_s16 }
  0x75   : > { %2823 = vmatprep.subr.bf16.mxu0 %v3005_v3  ;;  %p3262_p7 = scmp.lt.u32.totalorder %s3256_s16, %s294_s15 }
  0x76   : > { %p3261_p3 = por %p3260_p13, %p3259_p12 }
  0x78   : > { %2824 = vmatpush3.bf16.msra.mxu0 %v3005_v3  ;;  %p3263_p1 = por %p3262_p7, %p3261_p3 }
  0x79   : > { %2825 = vmatprep.subr.bf16.mxu0 %v3006_v7 }
  0x7a   : > { %p3264_p2 = pnand %p3263_p1, %p3257_p10 }
  0x7c   : > { %2826 = vmatpush3.bf16.msra.mxu0 %v3006_v7 }
  0x7d   : > { %2827 = vmatprep.subr.bf16.mxu0 %v3007_v8 }
  0x80   : > { %2828 = vmatpush3.bf16.msra.mxu0 %v3007_v8 }
  0x81   : > { %2829 = vmatprep.subr.bf16.mxu0 %v3008_v9 }
  0x84   : > { %2830 = vmatpush3.bf16.msra.mxu0 %v3008_v9 }
  0x85   : > { %2831 = vmatprep.subr.bf16.mxu0 %v3009_v10 }
  0x88   : > { %2832 = vmatpush3.bf16.msra.mxu0 %v3009_v10 }
  0x8b   : > { %2834 = vmatmul.mubr.bf16.vlgmr.msra.gmra.mrb[0].mxu0 %v340_v15 }
  0x8c   : > { %2837 = vmatprep.mubr.bf16.mxu0 %v341_v16 }
  0x93   : > { %2838 = vmatmul.mubr.bf16.gmra.mrb[4].mxu0 %v342_v21 }
  0x94   : > { %2841 = vmatprep.mubr.bf16.mxu0 %v343_v22 }
  0x9b   : > { %2842 = vmatmul.mubr.bf16.gmra.mrb[8].mxu0 %v344_v27 }
  0x9c   : > { %2845 = vmatprep.mubr.bf16.mxu0 %v345_v28 }
  0xa3   : > { %2846 = vmatmul.mubr.bf16.gmra.mrb[12].mxu0 %v346_v31 }
  0xa4   : > { %3267 = shalt.err (!%p3264_p2)  }
  0xa5   : > { %s3268_s18 = scalar_lea.vmem %s3695_s13, 256  ;;  %s3272_s29 = scalar_lea.vmem %s3695_s13, 512 }
  0xa6   : > { %p3269_p4 = scmp.ne.s32.totalorder %s3695_s13, %s3268_s18  ;;  %p3273_p5 = scmp.lt.s32.totalorder %s3695_s13, %s3695_s13 }
  0xa7   : > { %p3274_p9 = scmp.lt.s32.totalorder %s3272_s29, %s3268_s18 }
  0xa9   : > { %p3275_p0 = por %p3274_p9, %p3273_p5 }
  0xab   : > { %p3276_p6 = pnand %p3275_p0, %p3269_p4 }
  0xad   : > { %3279 = shalt.err (!%p3276_p6)  }
  0xae   : > { %305 = dma.hbm_to_vmem [thread:$0]  %s294_s15, 256, %s3695_s13, [#allocation4] }
  0xaf   : > { %s2523_s20 = sshll.u32 %s4779_s14, 4  ;;  %s3419_s6 = smov [#allocation2 + $0x10]  }
  0xb0   : > { %s307_s4 = sadd.s32 %s2523_s20, %s2521_s9  ;;  %s319_s30 = sshll.u32 %s3419_s6, 4  ;;  %s320_s30 = int_to_ptr.vmem [resolvable:$true] %s319_s30 }
  0xb1   : > { %s2524_s7 = sshll.u32 %s307_s4, 4 }
  0xb2   : > { %s309_s17 = scalar_lea.hbm %s4602_s1, %s2524_s7 }
  0xb3   : > { %s3280_s8 = scalar_lea.hbm %s309_s17, 256  ;;  %p3283_p10 = scmp.lt.u32.totalorder %s309_s17, %s4602_s1 }
  0xb4   : > { %p3281_p8 = scmp.ne.s32.totalorder %s309_s17, %s3280_s8  ;;  %p3284_p12 = scmp.lt.u32.totalorder %s3258_s26, %s3280_s8 }
  0xb5   : > { %p3286_p3 = scmp.lt.u32.totalorder %s3280_s8, %s309_s17 }
  0xb6   : > { %p3285_p13 = por %p3284_p12, %p3283_p10 }
  0xb8   : > { %p3287_p7 = por %p3286_p3, %p3285_p13 }
  0xba   : > { %p3288_p1 = pnand %p3287_p7, %p3281_p8 }
  0xbc   : > { %3291 = shalt.err (!%p3288_p1)  }
  0xbd   : > { %s3292_s14 = scalar_lea.vmem %s320_s30, 256  ;;  %p3297_p4 = scmp.lt.s32.totalorder %s320_s30, %s3695_s13 }
  0xbe   : > { %p3293_p2 = scmp.ne.s32.totalorder %s320_s30, %s3292_s14  ;;  %p3298_p5 = scmp.lt.s32.totalorder %s3272_s29, %s3292_s14 }
  0xc0   : > { %p3299_p9 = por %p3298_p5, %p3297_p4 }
  0xc2   : > { %p3300_p0 = pnand %p3299_p9, %p3293_p2 }
  0xc4   : > { %3303 = shalt.err (!%p3300_p0)  }
  0xc5   : > { %322 = dma.hbm_to_vmem [thread:$0]  %s309_s17, 256, %s320_s30, [#allocation4 + $0x1]  ;;  %v3720_v32 = vld [vmem:[%s4604_s3] ss:$0 sm:$0xff]  ;;  %vm4621_vm0 = vcmask 523264  }
  0xc6   : > { %s4650_s13 = sshll.u32 %s3632_s21, 7 }
  0xc7   : > { %s3820_s26 = scalar_lea.vmem [#allocation10], %s4650_s13 }
 0x15e   : > { %v2835_v33 = vpop.f32.mrb[0].mxu0 }
 0x15f   : > { %v3723_v34 = vadd.f32 %v2835_v33, %v3720_v32  ;;  %v452_v35 = vpop.f32.mrb[1].mxu0 }
 0x160   : > { %v3726_v36 = vadd.f32 %v3720_v32, %v452_v35  ;;  %v2836_v37 = vpop.f32.mrb[2].mxu0 }
 0x161   : > { %v2536_v38 = vmul.f32 -1.442695, %v3723_v34  ;;  %v3730_v39 = vadd.f32 %v2836_v37, %v3720_v32  ;;  %v455_v40 = vpop.f32.mrb[3].mxu0 }
 0x162   : > { %v2534_v41 = vmul.f32 -1.442695, %v3726_v36  ;;  %v3734_v42 = vadd.f32 %v3720_v32, %v455_v40 }
 0x163   : > { %3010 = vpow2.f32 %v2536_v38  ;;  %v2537_v43 = vmul.f32 -1.442695, %v3730_v39 }
 0x164   : > { %3012 = vpow2.f32 %v2534_v41  ;;  %v2535_v44 = vmul.f32 -1.442695, %v3734_v42 }
 0x165   : > { %3014 = vpow2.f32 %v2537_v43 }
 0x166   : > { %3016 = vpow2.f32 %v2535_v44  ;;  %v2839_v45 = vpop.f32.mrb[4].mxu0 }
 0x167   : > { %v3739_v46 = vadd.f32 %v2839_v45, %v3720_v32  ;;  %v468_v47 = vpop.f32.mrb[5].mxu0 }
 0x168   : > { %v3742_v48 = vadd.f32 %v3720_v32, %v468_v47  ;;  %v2840_v49 = vpop.f32.mrb[6].mxu0 }
 0x169   : > { %v2540_v50 = vmul.f32 -1.442695, %v3739_v46  ;;  %v3746_v51 = vadd.f32 %v2840_v49, %v3720_v32  ;;  %v471_v52 = vpop.f32.mrb[7].mxu0 }
 0x16a   : > { %v2538_v53 = vmul.f32 -1.442695, %v3742_v48  ;;  %v3750_v54 = vadd.f32 %v3720_v32, %v471_v52 }
 0x16b   : > { %3018 = vpow2.f32 %v2540_v50  ;;  %v2541_v55 = vmul.f32 -1.442695, %v3746_v51 }
 0x16c   : > { %3020 = vpow2.f32 %v2538_v53  ;;  %v2539_v56 = vmul.f32 -1.442695, %v3750_v54 }
 0x16d   : > { %v3011_v57 = vpop.eup %3010  ;;  %3022 = vpow2.f32 %v2541_v55 }
 0x16e   : > { %v3013_v58 = vpop.eup %3012  ;;  %v565_v59 = vadd.f32 1.0, %v3011_v57  ;;  %3024 = vpow2.f32 %v2539_v56  ;;  %v2843_v60 = vpop.f32.mrb[8].mxu0 }
 0x16f   : > { %v3015_v61 = vpop.eup %3014  ;;  %v563_v62 = vadd.f32 1.0, %v3013_v58  ;;  %v3755_v63 = vadd.f32 %v2843_v60, %v3720_v32  ;;  %v484_v0 = vpop.f32.mrb[9].mxu0 }
 0x170   : > { %v3017_v1 = vpop.eup %3016  ;;  %3026 = vrcp.f32 %v565_v59  ;;  %v566_v2 = vadd.f32 1.0, %v3015_v61  ;;  %v3758_v3 = vadd.f32 %v3720_v32, %v484_v0  ;;  %v2844_v4 = vpop.f32.mrb[10].mxu0 }
 0x171   : > { %3028 = vrcp.f32 %v563_v62  ;;  %v564_v5 = vadd.f32 1.0, %v3017_v1  ;;  %v2544_v6 = vmul.f32 -1.442695, %v3755_v63  ;;  %v3762_v7 = vadd.f32 %v2844_v4, %v3720_v32  ;;  %v487_v8 = vpop.f32.mrb[11].mxu0 }
 0x172   : > { %3030 = vrcp.f32 %v566_v2  ;;  %v2542_v9 = vmul.f32 -1.442695, %v3758_v3  ;;  %v3766_v10 = vadd.f32 %v3720_v32, %v487_v8 }
 0x173   : > { %3032 = vrcp.f32 %v564_v5  ;;  %v2545_v11 = vmul.f32 -1.442695, %v3762_v7 }
 0x174   : > { %3034 = vpow2.f32 %v2544_v6  ;;  %v2543_v12 = vmul.f32 -1.442695, %v3766_v10 }
 0x175   : > { %v3019_v13 = vpop.eup %3018  ;;  %3036 = vpow2.f32 %v2542_v9 }
 0x176   : > { %v3021_v14 = vpop.eup %3020  ;;  %v569_v15 = vadd.f32 1.0, %v3019_v13  ;;  %3038 = vpow2.f32 %v2545_v11  ;;  %v2847_v16 = vpop.f32.mrb[12].mxu0 }
 0x177   : > { %v3023_v17 = vpop.eup %3022  ;;  %v567_v18 = vadd.f32 1.0, %v3021_v14  ;;  %3040 = vpow2.f32 %v2543_v12  ;;  %v3771_v19 = vadd.f32 %v2847_v16, %v3720_v32  ;;  %v500_v20 = vpop.f32.mrb[13].mxu0 }
 0x178   : > { %v3025_v21 = vpop.eup %3024  ;;  %3042 = vrcp.f32 %v569_v15  ;;  %v570_v22 = vadd.f32 1.0, %v3023_v17  ;;  %v3774_v23 = vadd.f32 %v3720_v32, %v500_v20  ;;  %v2848_v24 = vpop.f32.mrb[14].mxu0 }
 0x179   : > { %3044 = vrcp.f32 %v567_v18  ;;  %v568_v25 = vadd.f32 1.0, %v3025_v21  ;;  %v2548_v26 = vmul.f32 -1.442695, %v3771_v19  ;;  %v3778_v27 = vadd.f32 %v2848_v24, %v3720_v32  ;;  %v503_v28 = vpop.f32.mrb[15].mxu0 }
 0x17a   : > { %v3027_v29 = vpop.eup %3026  ;;  %3046 = vrcp.f32 %v570_v22  ;;  %v2546_v30 = vmul.f32 -1.442695, %v3774_v23  ;;  %v3782_v31 = vadd.f32 %v3720_v32, %v503_v28 }
 0x17b   : > { %v3029_v33 = vpop.eup %3028  ;;  %v613_v35 = vmul.f32 %v3027_v29, %v3723_v34  ;;  %3048 = vrcp.f32 %v568_v25  ;;  %v2549_v37 = vmul.f32 -1.442695, %v3778_v27 }
 0x17c   : > { %v3031_v38 = vpop.eup %3030  ;;  %v611_v40 = vmul.f32 %v3029_v33, %v3726_v36  ;;  %3050 = vpow2.f32 %v2548_v26  ;;  %v2547_v41 = vmul.f32 -1.442695, %v3782_v31 }
 0x17d   : > { %v3033_v43 = vpop.eup %3032  ;;  %630 = vst.msk [vmem:[#allocation3 + $0x30] sm:$0xff] %vm4621_vm0, %v613_v35  ;;  %v614_v44 = vmul.f32 %v3031_v38, %v3730_v39  ;;  %3052 = vpow2.f32 %v2546_v30 }
 0x17e   : > { %v3035_v32 = vpop.eup %3034  ;;  %628 = vst.msk [vmem:[#allocation3 + $0x20] sm:$0xff] %vm4621_vm0, %v611_v40  ;;  %v612_v34 = vmul.f32 %v3033_v43, %v3734_v42  ;;  %3054 = vpow2.f32 %v2549_v37 }
 0x17f   : > { %v3037_v45 = vpop.eup %3036  ;;  %631 = vst.msk [vmem:[#allocation3 + $0x38] sm:$0xff] %vm4621_vm0, %v614_v44  ;;  %v573_v47 = vadd.f32 1.0, %v3035_v32  ;;  %3056 = vpow2.f32 %v2547_v41 }
 0x180   : > { %v3039_v36 = vpop.eup %3038  ;;  %629 = vst.msk [vmem:[#allocation3 + $0x28] sm:$0xff] %vm4621_vm0, %v612_v34  ;;  %v571_v49 = vadd.f32 1.0, %v3037_v45 }
 0x181   : > { %v3041_v50 = vpop.eup %3040  ;;  %3058 = vrcp.f32 %v573_v47  ;;  %v574_v52 = vadd.f32 1.0, %v3039_v36 }
 0x182   : > { %v3043_v39 = vpop.eup %3042  ;;  %3060 = vrcp.f32 %v571_v49  ;;  %v572_v53 = vadd.f32 1.0, %v3041_v50 }
 0x183   : > { %v3045_v55 = vpop.eup %3044  ;;  %v617_v56 = vmul.f32 %v3043_v39, %v3739_v46  ;;  %3062 = vrcp.f32 %v574_v52 }
 0x184   : > { %v3047_v42 = vpop.eup %3046  ;;  %v615_v57 = vmul.f32 %v3045_v55, %v3742_v48  ;;  %3064 = vrcp.f32 %v572_v53 }
 0x185   : > { %v3049_v58 = vpop.eup %3048  ;;  %634 = vst.msk [vmem:[#allocation3 + $0x50] sm:$0xff] %vm4621_vm0, %v617_v56  ;;  %v618_v59 = vmul.f32 %v3047_v42, %v3746_v51 }
 0x186   : > { %v3051_v60 = vpop.eup %3050  ;;  %632 = vst.msk [vmem:[#allocation3 + $0x40] sm:$0xff] %vm4621_vm0, %v615_v57  ;;  %v616_v61 = vmul.f32 %v3049_v58, %v3750_v54 }
 0x187   : > { %v3053_v62 = vpop.eup %3052  ;;  %635 = vst.msk [vmem:[#allocation3 + $0x58] sm:$0xff] %vm4621_vm0, %v618_v59  ;;  %v577_v0 = vadd.f32 1.0, %v3051_v60 }
 0x188   : > { %v3055_v46 = vpop.eup %3054  ;;  %633 = vst.msk [vmem:[#allocation3 + $0x48] sm:$0xff] %vm4621_vm0, %v616_v61  ;;  %v575_v1 = vadd.f32 1.0, %v3053_v62 }
 0x189   : > { %v3057_v48 = vpop.eup %3056  ;;  %3066 = vrcp.f32 %v577_v0  ;;  %v578_v2 = vadd.f32 1.0, %v3055_v46 }
 0x18a   : > { %3068 = vrcp.f32 %v575_v1  ;;  %v576_v4 = vadd.f32 1.0, %v3057_v48 }
 0x18b   : > { %v3059_v5 = vpop.eup %3058  ;;  %3070 = vrcp.f32 %v578_v2 }
 0x18c   : > { %v3061_v51 = vpop.eup %3060  ;;  %v621_v6 = vmul.f32 %v3059_v5, %v3755_v63  ;;  %3072 = vrcp.f32 %v576_v4 }
 0x18d   : > { %v3063_v54 = vpop.eup %3062  ;;  %v619_v8 = vmul.f32 %v3061_v51, %v3758_v3 }
 0x18e   : > { %v3065_v9 = vpop.eup %3064  ;;  %638 = vst.msk [vmem:[#allocation3 + $0x70] sm:$0xff] %vm4621_vm0, %v621_v6  ;;  %v622_v11 = vmul.f32 %v3063_v54, %v3762_v7 }
 0x18f   : > { %636 = vst.msk [vmem:[#allocation3 + $0x60] sm:$0xff] %vm4621_vm0, %v619_v8  ;;  %v620_v12 = vmul.f32 %v3065_v9, %v3766_v10 }
 0x190   : > { %639 = vst.msk [vmem:[#allocation3 + $0x78] sm:$0xff] %vm4621_vm0, %v622_v11 }
 0x191   : > { %637 = vst.msk [vmem:[#allocation3 + $0x68] sm:$0xff] %vm4621_vm0, %v620_v12 }
 0x193   : > { %v3067_v13 = vpop.eup %3066 }
 0x194   : > { %v3069_v63 = vpop.eup %3068  ;;  %v625_v14 = vmul.f32 %v3067_v13, %v3771_v19 }
 0x195   : > { %v3071_v15 = vpop.eup %3070  ;;  %v623_v3 = vmul.f32 %v3069_v63, %v3774_v23 }
 0x196   : > { %v3073_v16 = vpop.eup %3072  ;;  %642 = vst.msk [vmem:[#allocation3 + $0x90] sm:$0xff] %vm4621_vm0, %v625_v14  ;;  %v626_v7 = vmul.f32 %v3071_v15, %v3778_v27 }
 0x197   : > { %640 = vst.msk [vmem:[#allocation3 + $0x80] sm:$0xff] %vm4621_vm0, %v623_v3  ;;  %v624_v10 = vmul.f32 %v3073_v16, %v3782_v31 }
 0x198   : > { %643 = vst.msk [vmem:[#allocation3 + $0x98] sm:$0xff] %vm4621_vm0, %v626_v7 }
 0x199   : > { %641 = vst.msk [vmem:[#allocation3 + $0x88] sm:$0xff] %vm4621_vm0, %v624_v10 }
 0x19a   : > { %3372 = dma.done.wait [#allocation4], 256 }
 0x19b   : > { %3373 = vsyncadd [#allocation4], 4294967040 }
 0x19c   : > { %3374 = dma.done.wait [#allocation4 + $0x1], 256 }
 0x19d   : > { %3375 = vsyncadd [#allocation4 + $0x1], 4294967040  ;;  %v3074_v17 = vld [vmem:[%s4603_s2] sm:$0xff]   ;;  %v3075_v18 = vld [vmem:[%s4603_s2 + $0x8] sm:$0xff]   ;;  %v3420_v31 = vmov 0.0   ;;  %s3421_s29 = smov 64   ;;  %v823_v3 = vlaneseq }
 0x19e   : > { %2849 = vmatprep.subr.bf16.mxu1 %v3074_v17  ;;  %v3076_v19 = vld [vmem:[%s4603_s2 + $0x10] sm:$0xff]   ;;  %v3077_v20 = vld [vmem:[%s4603_s2 + $0x18] sm:$0xff]   ;;  %v649_v21 = vld [vmem:[#allocation2] sm:$0xff]  ;;  %804 = vst.msk [vmem:[#allocation3 + $0x8] sm:$0xff] %vm4621_vm0, %v3420_v31  ;;  %p813_p6 = scmp.lt.s32.totalorder %s3394_s24, 1  ;;  %p805_p8 = scmp.gt.s32.totalorder %s3394_s24, 0 }
 0x19f   : > { %2850 = vmatpush3.bf16.msra.mxu1 %v3074_v17  ;;  %v650_v22 = vld [vmem:[#allocation2 + $0x8] sm:$0xff]  ;;  %v3078_v24 = vld [vmem:[%s4603_s2 + $0x20] sm:$0xff]   ;;  %v3080_v26 = vld [vmem:[%s4603_s2 + $0x30] sm:$0xff]   ;;  %821 = vst.msk [vmem:[#allocation3 + $0xb0] sm:$0xff] %vm4621_vm0, %v3420_v31  ;;  %v3858_v16 = vshrl.u32 %v823_v3, 7  ;;  %vm3422_vm3 = vmmov 1  }
 0x1a0   : > { %2851 = vmatprep.subr.bf16.mxu1 %v3075_v18  ;;  %v653_v23 = vpack.c.bf16 %v650_v22, %v649_v21  ;;  %v3079_v25 = vld [vmem:[%s4603_s2 + $0x28] sm:$0xff]   ;;  %v3081_v27 = vld [vmem:[%s4603_s2 + $0x38] sm:$0xff]   ;;  %v651_v28 = vld [vmem:[#allocation2 + $0x10] sm:$0xff]  ;;  %s814_s7 = scalar_select %p813_p6, 1, 0 }
 0x1a1   : > { %v652_v29 = vld [vmem:[#allocation2 + $0x18] sm:$0xff]  ;;  %v1196_v33 = vld [vmem:[#allocation3 + $0x30] sm:$0xff]  ;;  %v3082_v38 = vld [vmem:[#allocation8 + $0x40] sm:$0xff]   ;;  %v844_v7 = vand.u32 15, %v3858_v16  ;;  %s806_s6 = scalar_select %p805_p8, 1, 0 }
 0x1a2   : > { %2865 = vmatprep.mubr.bf16.mxu1 %v653_v23  ;;  %v654_v30 = vpack.c.bf16 %v652_v29, %v651_v28  ;;  %v1197_v35 = vld [vmem:[#allocation3 + $0x38] sm:$0xff]  ;;  %v3083_v40 = vld [vmem:[#allocation8] sm:$0xff]   ;;  %v3086_v44 = vld [vmem:[#allocation8 + $0x48] sm:$0xff]   ;;  %2677 = vmatprep.subr.bf16.mxu0 %v3082_v38  ;;  %v815_v29 = vstv %s814_s7  ;;  %v826_v38 = vadd.s32 16, %v3858_v16  ;;  %s2650_s16 = sshll.u32 %s3394_s24, 4  ;;  %s2643_s17 = sshll.u32 %s3398_s25, 5 }
 0x1a3   : > { %2852 = vmatpush3.bf16.msra.mxu1 %v3075_v18  ;;  %v3848_v37 = vpack.c.bf16 %v1197_v35, %v1196_v33  ;;  %v3084_v41 = vld [vmem:[#allocation8 + $0xc0] sm:$0xff]   ;;  %v3088_v32 = vld [vmem:[#allocation8 + $0xc8] sm:$0xff]   ;;  %2678 = vmatpush3.bf16.msra.mxu0 %v3083_v40  ;;  %v3090_v47 = vld [vmem:[#allocation8 + $0x50] sm:$0xff]   ;;  %vm3861_vm1 = vcmp.ge.s32.totalorder %v844_v7, 1  ;;  %v807_v35 = vstv %s806_s6  ;;  %vm3877_vm5 = vcmp.eq.s32.totalorder %v815_v29, 1  ;;  %s2378_s8 = sadd.s32 %s2650_s16, %s2643_s17  ;;  %s2381_s18 = sshll.u32 %s3820_s26, 4  ;;  %s4544_s18 = int_to_ptr.vmem [resolvable:$true] %s2381_s18 }
 0x1a4   : > { %2853 = vmatprep.subr.bf16.mxu1 %v3076_v19  ;;  %v3085_v43 = vld [vmem:[#allocation8 + $0x80] sm:$0xff]   ;;  %v3087_v34 = vld [vmem:[#allocation8 + $0x8] sm:$0xff]   ;;  %2679 = vmatprep.subr.bf16.mxu0 %v3086_v44  ;;  %v3092_v36 = vld [vmem:[#allocation8 + $0xd0] sm:$0xff]   ;;  %vm3883_vm6 = vcmp.eq.s32.totalorder %v807_v35, 1  ;;  %s2644_s11 = sshll.u32 %s2378_s8, 7  ;;  %s4758_s9 = sld [smem:[#allocation29_spill]] }
 0x1a5   : > { %1406 = vrot.lane.b32.xlu0 %v3848_v37, %s3421_s29  ;;  %v3089_v45 = vld [vmem:[#allocation8 + $0x88] sm:$0xff]   ;;  %v3091_v49 = vld [vmem:[#allocation8 + $0x10] sm:$0xff]   ;;  %v3094_v52 = vld [vmem:[#allocation8 + $0x58] sm:$0xff]   ;;  %s2365_s13 = scalar_lea.sflag [#allocation7], %s3632_s21 }
 0x1a6   : > { %v3093_v50 = vld [vmem:[#allocation8 + $0x90] sm:$0xff]   ;;  %v3096_v39 = vld [vmem:[#allocation8 + $0xd8] sm:$0xff]   ;;  %v3098_v56 = vld [vmem:[#allocation8 + $0x60] sm:$0xff]  }
 0x1a7   : > { %2854 = vmatpush3.bf16.msra.mxu1 %v3076_v19  ;;  %2680 = vmatpush3.bf16.msra.mxu0 %v3087_v34  ;;  %v3095_v53 = vld [vmem:[#allocation8 + $0x18] sm:$0xff]   ;;  %v3100_v42 = vld [vmem:[#allocation8 + $0xe0] sm:$0xff]   ;;  %v3102_v59 = vld [vmem:[#allocation8 + $0x68] sm:$0xff]  }
 0x1a8   : > { %2855 = vmatprep.subr.bf16.mxu1 %v3077_v20  ;;  %2681 = vmatprep.subr.bf16.mxu0 %v3090_v47  ;;  %v3097_v55 = vld [vmem:[#allocation8 + $0x98] sm:$0xff]   ;;  %v3099_v57 = vld [vmem:[#allocation8 + $0x20] sm:$0xff]   ;;  %v3104_v60 = vld [vmem:[#allocation8 + $0xe8] sm:$0xff]  }
 0x1a9   : > { %v3101_v58 = vld [vmem:[#allocation8 + $0xa0] sm:$0xff]   ;;  %v3103_v61 = vld [vmem:[#allocation8 + $0x28] sm:$0xff]   ;;  %v3106_v0 = vld [vmem:[#allocation8 + $0x70] sm:$0xff]  }
 0x1aa   : > { %v3105_v62 = vld [vmem:[#allocation8 + $0xa8] sm:$0xff]   ;;  %v3108_v46 = vld [vmem:[#allocation8 + $0xf0] sm:$0xff]   ;;  %v3110_v2 = vld [vmem:[#allocation8 + $0x78] sm:$0xff]   ;;  %s4542_s15 = scalar_lea.hbm %s4758_s9, %s2644_s11 }
 0x1ab   : > { %2856 = vmatpush3.bf16.msra.mxu1 %v3077_v20  ;;  %2682 = vmatpush3.bf16.msra.mxu0 %v3091_v49  ;;  %v3107_v1 = vld [vmem:[#allocation8 + $0x30] sm:$0xff]   ;;  %v2550_v4 = vld [vmem:[%s4604_s3] ss:$0 sm:$0xff]  ;;  %vm1120_vm2 = vmpackc.low %vm3861_vm1, %vm3861_vm1 }
 0x1ac   : > { %2857 = vmatprep.subr.bf16.mxu1 %v3078_v24  ;;  %2683 = vmatprep.subr.bf16.mxu0 %v3094_v52  ;;  %v3109_v48 = vld [vmem:[#allocation8 + $0xb0] sm:$0xff]   ;;  %vm1121_vm4 = vmpackc.low %vm3422_vm3, %vm3422_vm3  ;;  %v858_v52 = vand.u32 15, %v826_v38  ;;  %v1194_v35 = vld [vmem:[#allocation3 + $0x20] sm:$0xff] }
 0x1ad   : > { %v1068_v31 = vld [vmem:[#allocation3 + $0x2f] sm:$0xff]  ;;  %v1069_v33 = vld [vmem:[#allocation3 + $0x37] sm:$0xff] }
 0x1ae   : > { %v3881_v44 = vpack.c.bf16 %v1069_v33, %v1068_v31  ;;  %vm3921_vm10 = vcmp.ge.s32.totalorder %v858_v52, 1 }
 0x1af   : > { %2858 = vmatpush3.bf16.msra.mxu1 %v3078_v24  ;;  %2684 = vmatpush3.bf16.msra.mxu0 %v3095_v53  ;;  %v3111_v53 = vld [vmem:[#allocation8 + $0x38] sm:$0xff]   ;;  %vm1122_vm12 = vmpackc.low %vm3921_vm10, %vm3921_vm10 }
 0x1b0   : > { %2859 = vmatprep.subr.bf16.mxu1 %v3079_v25  ;;  %2685 = vmatprep.subr.bf16.mxu0 %v3098_v56 }
 0x1b3   : > { %2860 = vmatpush3.bf16.msra.mxu1 %v3079_v25  ;;  %2686 = vmatpush3.bf16.msra.mxu0 %v3099_v57  ;;  %v3423_v25 = vmov 0  }
 0x1b4   : > { %2861 = vmatprep.subr.bf16.mxu1 %v3080_v26  ;;  %2687 = vmatprep.subr.bf16.mxu0 %v3102_v59  ;;  %v3873_v28 = vsel %vm1121_vm4, 65537, %v3423_v25  ;;  %v3112_v59 = vld [vmem:[#allocation8 + $0xf8] sm:$0xff]   ;;  %v1138_v3 = vsel %vm1122_vm12, 65537, %v3423_v25 }
 0x1b7   : > { %2862 = vmatpush3.bf16.msra.mxu1 %v3080_v26  ;;  %2688 = vmatpush3.bf16.msra.mxu0 %v3103_v61  ;;  %v1136_v26 = vsel %vm1120_vm2, 65537, %v3423_v25 }
 0x1b8   : > { %2863 = vmatprep.subr.bf16.mxu1 %v3081_v27  ;;  %2689 = vmatprep.subr.bf16.mxu0 %v3106_v0  ;;  %v3113_v0 = vld [vmem:[#allocation8 + $0xb8] sm:$0xff]  }
 0x1bb   : > { %2864 = vmatpush3.bf16.msra.mxu1 %v3081_v27  ;;  %2690 = vmatpush3.bf16.msra.mxu0 %v3107_v1  ;;  %v825_v27 = vadd.s32 8, %v3858_v16 }
 0x1bc   : > { %2741 = vmatprep.subr.bf16.mxu1 %v3084_v41  ;;  %2691 = vmatprep.subr.bf16.mxu0 %v3110_v2 }
 0x1bd   : > { %v851_v40 = vand.u32 15, %v825_v27 }
 0x1be   : > { %2866 = vmatmul.mubr.bf16.vlgmr.msra.gmra.mrb[0].mxu1 %v654_v30  ;;  %v2563_v30 = vcombine.low %v1136_v26, %v3873_v28 }
 0x1bf   : > { %2742 = vmatpush3.bf16.msra.mxu1 %v3085_v43  ;;  %vm3899_vm8 = vcmp.lt.s32.totalorder %v851_v40, 15  ;;  %2692 = vmatpush3.bf16.msra.mxu0 %v3111_v53  ;;  %v1195_v40 = vld [vmem:[#allocation3 + $0x28] sm:$0xff]  ;;  %v1221_v43 = vld [vmem:[#allocation3 + $0x39] sm:$0xff] }
 0x1c0   : > { %2743 = vmatprep.subr.bf16.mxu1 %v3088_v32  ;;  %vm3887_vm7 = vcmp.ne.s16.totalorder %v2563_v30, 0  ;;  %vm1273_vm9 = vmpackc.low %vm3899_vm8, %vm3899_vm8  ;;  %v2564_v30 = vcombine.low %v1138_v3, %v3873_v28 }
 0x1c3   : > { %2744 = vmatpush3.bf16.msra.mxu1 %v3089_v45  ;;  %v832_v45 = vadd.s32 64, %v3858_v16 }
 0x1c4   : > { %2745 = vmatprep.subr.bf16.mxu1 %v3092_v36  ;;  %v827_v36 = vadd.s32 24, %v3858_v16 }
 0x1c6   : > { %v865_v1 = vand.u32 15, %v827_v36 }
 0x1c7   : > { %2746 = vmatpush3.bf16.msra.mxu1 %v3093_v50 }
 0x1c8   : > { %2747 = vmatprep.subr.bf16.mxu1 %v3096_v39  ;;  %vm3928_vm11 = vcmp.lt.s32.totalorder %v865_v1, 15  ;;  %v1222_v1 = vld [vmem:[#allocation3 + $0x41] sm:$0xff] }
 0x1c9   : > { %vm1275_vm13 = vmpackc.low %vm3928_vm11, %vm3928_vm11 }
 0x1ca   : > { %v1291_v26 = vsel %vm1275_vm13, 65537, %v3423_v25 }
 0x1cb   : > { %2748 = vmatpush3.bf16.msra.mxu1 %v3097_v55  ;;  %v1372_v55 = vsel %vm3887_vm7, %v3881_v44, 0 }
 0x1cc   : > { %2749 = vmatprep.subr.bf16.mxu1 %v3100_v42 }
 0x1cf   : > { %2750 = vmatpush3.bf16.msra.mxu1 %v3101_v58  ;;  %v1201_v58 = vld [vmem:[#allocation3 + $0x58] sm:$0xff] }
 0x1d0   : > { %2751 = vmatprep.subr.bf16.mxu1 %v3104_v60 }
 0x1d3   : > { %2752 = vmatpush3.bf16.msra.mxu1 %v3105_v62 }
 0x1d4   : > { %2753 = vmatprep.subr.bf16.mxu1 %v3108_v46 }
 0x1d7   : > { %2754 = vmatpush3.bf16.msra.mxu1 %v3109_v48  ;;  %v828_v48 = vadd.s32 32, %v3858_v16 }
 0x1d8   : > { %2755 = vmatprep.subr.bf16.mxu1 %v3112_v59 }
 0x1db   : > { %2756 = vmatpush3.bf16.msra.mxu1 %v3113_v0 }
 0x217   : > { %v3892_v39 = vpop.permute.xlu0 %1406 }
 0x218   : > { %v1569_v60 = vsel %vm4621_vm0, %v1372_v55, %v3892_v39 }
 0x219   : > { %2042 = vmatprep.mubr.bf16.mxu1 %v1569_v60  ;;  %v1070_v60 = vld [vmem:[#allocation3 + $0x3f] sm:$0xff] }
 0x291   : > { %v2867_v5 = vpop.f32.mrb[0].mxu1 }
 0x292   : > { %v769_v51 = vadd.f32 %v2867_v5, %v2550_v4  ;;  %v760_v6 = vpop.f32.mrb[1].mxu1  ;;  %v834_v5 = vadd.s32 80, %v3858_v16 }
 0x293   : > { %v761_v54 = vadd.f32 %v2550_v4, %v760_v6  ;;  %v2868_v8 = vpop.f32.mrb[2].mxu1  ;;  %v1289_v6 = vsel %vm1273_vm9, 65537, %v3423_v25 }
 0x294   : > { %v2561_v9 = vmul.f32 -1.442695, %v769_v51  ;;  %v772_v11 = vadd.f32 %v2868_v8, %v2550_v4  ;;  %v763_v12 = vpop.f32.mrb[3].mxu1  ;;  %v872_v8 = vand.u32 15, %v828_v48  ;;  %v1223_v48 = vld [vmem:[#allocation3 + $0x49] sm:$0xff]  ;;  %v914_v7 = vand.u32 15, %v834_v5 }
 0x295   : > { %v2559_v13 = vmul.f32 -1.442695, %v761_v54  ;;  %v3855_v63 = vadd.f32 %v2550_v4, %v763_v12  ;;  %v829_v4 = vadd.s32 40, %v3858_v16 }
 0x296   : > { %3118 = vpow2.f32 %v2561_v9  ;;  %v2562_v14 = vmul.f32 -1.442695, %v772_v11  ;;  %v1218_v9 = vld [vmem:[#allocation3 + $0x21] sm:$0xff]  ;;  %vm3945_vm14 = vcmp.ge.s32.totalorder %v872_v8, 1 }
 0x297   : > { %3120 = vpow2.f32 %v2559_v13  ;;  %v2560_v15 = vmul.f32 -1.442695, %v3855_v63  ;;  %v879_v12 = vand.u32 15, %v829_v4  ;;  %v830_v13 = vadd.s32 48, %v3858_v16  ;;  %vm1124_vm2 = vmpackc.low %vm3945_vm14, %vm3945_vm14 }
 0x298   : > { %3122 = vpow2.f32 %v2562_v14  ;;  %v2571_v14 = vcombine.low %v3873_v28, %v1289_v6  ;;  %v1140_v36 = vsel %vm1124_vm2, 65537, %v3423_v25 }
 0x299   : > { %3124 = vpow2.f32 %v2560_v15  ;;  %vm3949_vm15 = vcmp.lt.s32.totalorder %v879_v12, 15  ;;  %v886_v27 = vand.u32 15, %v830_v13  ;;  %v4033_v12 = vpack.c.bf16 %v1223_v48, %v1222_v1  ;;  %v1227_v1 = vld [vmem:[#allocation3 + $0x69] sm:$0xff] }
 0x29a   : > { %vm3957_vm1 = vcmp.ne.s16.totalorder %v2571_v14, 0  ;;  %vm1277_vm3 = vmpackc.low %vm3949_vm15, %vm3949_vm15 }
 0x29b   : > { %vm3981_vm4 = vcmp.ge.s32.totalorder %v886_v27, 1  ;;  %v1293_v53 = vsel %vm1277_vm3, 65537, %v3423_v25  ;;  %vm4069_vm3 = vcmp.ge.s32.totalorder %v914_v7, 1  ;;  %v839_v7 = vadd.s32 120, %v3858_v16 }
 0x29c   : > { %vm1126_vm8 = vmpackc.low %vm3981_vm4, %vm3981_vm4 }
 0x2a0   : > { %v3119_v10 = vpop.eup %3118 }
 0x2a1   : > { %v3121_v17 = vpop.eup %3120  ;;  %v789_v18 = vadd.f32 1.0, %v3119_v10 }
 0x2a2   : > { %v3123_v20 = vpop.eup %3122  ;;  %v787_v21 = vadd.f32 1.0, %v3121_v17 }
 0x2a3   : > { %v3125_v22 = vpop.eup %3124  ;;  %3126 = vrcp.f32 %v789_v18  ;;  %v790_v23 = vadd.f32 1.0, %v3123_v20  ;;  %v831_v20 = vadd.s32 56, %v3858_v16 }
 0x2a4   : > { %3128 = vrcp.f32 %v787_v21  ;;  %v788_v24 = vadd.f32 1.0, %v3125_v22 }
 0x2a5   : > { %3130 = vrcp.f32 %v790_v23  ;;  %v1198_v23 = vld [vmem:[#allocation3 + $0x40] sm:$0xff] }
 0x2a6   : > { %3132 = vrcp.f32 %v788_v24  ;;  %v1199_v24 = vld [vmem:[#allocation3 + $0x48] sm:$0xff] }
 0x2a7   : > { %v3976_v38 = vpack.c.bf16 %v1199_v24, %v1198_v23  ;;  %v1202_v24 = vld [vmem:[#allocation3 + $0x60] sm:$0xff] }
 0x2ad   : > { %v3127_v41 = vpop.eup %3126 }
 0x2ae   : > { %v3129_v32 = vpop.eup %3128  ;;  %v801_v34 = vmul.f32 %v3127_v41, %v769_v51  ;;  %v3925_v51 = vld [vmem:[#allocation8 + $0x100] sm:$0xff]   ;;  %v1220_v41 = vld [vmem:[#allocation3 + $0x31] sm:$0xff] }
 0x2af   : > { %v3131_v49 = vpop.eup %3130  ;;  %v799_v50 = vmul.f32 %v3129_v32, %v761_v54  ;;  %2869 = vmatprep.subr.bf16.mxu0 %v3925_v51  ;;  %2893 = vmatprep.subr.bf16.mxu1 %v3925_v51  ;;  %v2572_v32 = vcombine.low %v3873_v28, %v1291_v26  ;;  %v1203_v26 = vld [vmem:[#allocation3 + $0x68] sm:$0xff] }
 0x2b0   : > { %v3133_v56 = vpop.eup %3132  ;;  %v817_v42 = vsel %vm3877_vm5, %v801_v34, 0.0  ;;  %v802_v57 = vmul.f32 %v3131_v49, %v772_v11  ;;  %v1219_v11 = vld [vmem:[#allocation3 + $0x29] sm:$0xff]  ;;  %v893_v34 = vand.u32 15, %v831_v20 }
 0x2b1   : > { %819 = vst.msk [vmem:[#allocation3 + $0xa0] sm:$0xff] %vm4621_vm0, %v817_v42  ;;  %v809_v61 = vsel %vm3883_vm6, %v799_v50, 0.0  ;;  %v800_v62 = vmul.f32 %v3133_v56, %v3855_v63  ;;  %v1067_v63 = vld [vmem:[#allocation3 + $0x27] sm:$0xff]  ;;  %v3942_v15 = vpack.c.bf16 %v1219_v11, %v1218_v9  ;;  %v833_v50 = vadd.s32 72, %v3858_v16 }
 0x2b2   : > { %811 = vst.msk [vmem:[#allocation3 + $0x10] sm:$0xff] %vm4621_vm0, %v809_v61  ;;  %v818_v46 = vsel %vm3877_vm5, %v802_v57, 0.0  ;;  %vm3986_vm5 = vcmp.ne.s16.totalorder %v2564_v30, 0  ;;  %v3995_v56 = vpack.c.bf16 %v1195_v40, %v1194_v35  ;;  %v3997_v42 = vpack.c.bf16 %v1221_v43, %v1220_v41  ;;  %v1200_v57 = vld [vmem:[#allocation3 + $0x50] sm:$0xff]  ;;  %v1071_v61 = vld [vmem:[#allocation3 + $0x47] sm:$0xff]  ;;  %v1229_v40 = vld [vmem:[#allocation3 + $0x79] sm:$0xff] }
 0x2b3   : > { %820 = vst.msk [vmem:[#allocation3 + $0xa8] sm:$0xff] %vm4621_vm0, %v818_v46  ;;  %v810_v2 = vsel %vm3883_vm6, %v800_v62, 0.0  ;;  %v1361_v33 = vsel %vm3957_vm1, %v3942_v15, 0  ;;  %v1348_v55 = vsel %vm3986_vm5, %v3881_v44, 0  ;;  %vm4001_vm6 = vcmp.ne.s16.totalorder %v2572_v32, 0 }
 0x2b4   : > { %812 = vst.msk [vmem:[#allocation3 + $0x18] sm:$0xff] %vm4621_vm0, %v810_v2  ;;  %v2565_v62 = vcombine.low %v1140_v36, %v3873_v28  ;;  %vm4009_vm9 = vcmp.lt.s32.totalorder %v893_v34, 15  ;;  %v900_v46 = vand.u32 15, %v832_v45  ;;  %v2573_v2 = vcombine.low %v3873_v28, %v1293_v53 }
 0x2b5   : > { %v907_v4 = vand.u32 15, %v833_v50  ;;  %v1362_v6 = vsel %vm4001_vm6, %v3997_v42, 0  ;;  %v4019_v54 = vpack.c.bf16 %v1201_v58, %v1200_v57  ;;  %v4021_v8 = vpack.c.bf16 %v1071_v61, %v1070_v60  ;;  %vm1279_vm10 = vmpackc.low %vm4009_vm9, %vm4009_vm9  ;;  %v1204_v50 = vld [vmem:[#allocation3 + $0x70] sm:$0xff]  ;;  %v1205_v58 = vld [vmem:[#allocation3 + $0x78] sm:$0xff] }
 0x2b6   : > { %v1142_v9 = vsel %vm1126_vm8, 65537, %v3423_v25  ;;  %vm4029_vm11 = vcmp.ne.s16.totalorder %v2565_v62, 0  ;;  %vm4035_vm12 = vcmp.ge.s32.totalorder %v900_v46, 1  ;;  %vm4040_vm13 = vcmp.ne.s16.totalorder %v2573_v2, 0  ;;  %vm1130_vm8 = vmpackc.low %vm4069_vm3, %vm4069_vm3  ;;  %v1074_v60 = vld [vmem:[#allocation3 + $0x5f] sm:$0xff]  ;;  %v1075_v61 = vld [vmem:[#allocation3 + $0x67] sm:$0xff] }
 0x2b7   : > { %vm4044_vm14 = vcmp.lt.s32.totalorder %v907_v4, 15  ;;  %v2566_v19 = vcombine.low %v1142_v9, %v3873_v28  ;;  %v1295_v20 = vsel %vm1279_vm10, 65537, %v3423_v25  ;;  %vm1128_vm15 = vmpackc.low %vm4035_vm12, %vm4035_vm12  ;;  %v1363_v23 = vsel %vm4040_vm13, %v4033_v12, 0  ;;  %v1226_v46 = vld [vmem:[#allocation3 + $0x61] sm:$0xff] }
 0x2b8   : > { %vm1281_vm2 = vmpackc.low %vm4044_vm14, %vm4044_vm14  ;;  %v2574_v35 = vcombine.low %v3873_v28, %v1295_v20  ;;  %v1144_v32 = vsel %vm1128_vm15, 65537, %v3423_v25  ;;  %v4079_v34 = vpack.c.bf16 %v1203_v26, %v1202_v24  ;;  %v837_v36 = vadd.s32 104, %v3858_v16  ;;  %v1206_v26 = vld [vmem:[#allocation3 + $0x80] sm:$0xff] }
 0x2b9   : > { %v1192_v10 = vld [vmem:[#allocation3 + $0x10] sm:$0xff]  ;;  %vm4073_vm4 = vcmp.ne.s16.totalorder %v2566_v19, 0  ;;  %v1297_v45 = vsel %vm1281_vm2, 65537, %v3423_v25  ;;  %v2567_v62 = vcombine.low %v1144_v32, %v3873_v28  ;;  %v838_v2 = vadd.s32 112, %v3858_v16  ;;  %v1380_v53 = vld [vmem:[#allocation3 + $0xa0] sm:$0xff] }
 0x2ba   : > { %vm4096_vm10 = vcmp.ne.s16.totalorder %v2574_v35, 0  ;;  %v2575_v48 = vcombine.low %v3873_v28, %v1297_v45  ;;  %v1146_v4 = vsel %vm1130_vm8, 65537, %v3423_v25  ;;  %v935_v5 = vand.u32 15, %v837_v36  ;;  %v1228_v35 = vld [vmem:[#allocation3 + $0x71] sm:$0xff]  ;;  %v1078_v45 = vld [vmem:[#allocation3 + $0x7f] sm:$0xff]  ;;  %v1079_v36 = vld [vmem:[#allocation3 + $0x87] sm:$0xff] }
 0x2bb   : > { %v1193_v17 = vld [vmem:[#allocation3 + $0x18] sm:$0xff]  ;;  %v4117_v9 = vpack.c.bf16 %v1205_v58, %v1204_v50  ;;  %v4119_v13 = vpack.c.bf16 %v1075_v61, %v1074_v60  ;;  %vm4124_vm2 = vcmp.ne.s16.totalorder %v2567_v62, 0  ;;  %v4128_v3 = vpack.c.bf16 %v1227_v1, %v1226_v46  ;;  %v1383_v59 = vld [vmem:[#allocation3 + $0xa1] sm:$0xff] }
 0x2bc   : > { %v1066_v18 = vld [vmem:[#allocation3 + $0x1f] sm:$0xff]  ;;  %v1208_v21 = vpack.c.bf16 %v1193_v17, %v1192_v10  ;;  %v836_v10 = vadd.s32 96, %v3858_v16  ;;  %v1072_v17 = vld [vmem:[#allocation3 + $0x4f] sm:$0xff]  ;;  %vm4131_vm3 = vcmp.ne.s16.totalorder %v2575_v48, 0  ;;  %v2568_v19 = vcombine.low %v1146_v4, %v3873_v28  ;;  %v1065_v4 = vld [vmem:[#allocation3 + $0x17] sm:$0xff] }
 0x2bd   : > { %v3954_v22 = vpack.c.bf16 %v1067_v63, %v1066_v18  ;;  %v835_v63 = vadd.s32 88, %v3858_v16  ;;  %v1073_v18 = vld [vmem:[#allocation3 + $0x57] sm:$0xff]  ;;  %vm4139_vm8 = vcmp.lt.s32.totalorder %v935_v5, 15  ;;  %v1351_v16 = vsel %vm4124_vm2, %v4119_v13, 0  ;;  %v1230_v48 = vld [vmem:[#allocation3 + $0x81] sm:$0xff] }
 0x2be   : > { %1402 = vrot.lane.b32.xlu1 %v1208_v21, %s3421_s29  ;;  %v1349_v21 = vsel %vm4029_vm11, %v4021_v8, 0  ;;  %v4066_v30 = vpack.c.bf16 %v1073_v18, %v1072_v17  ;;  %v928_v41 = vand.u32 15, %v836_v10  ;;  %v4699_v10 = vmov 0  ;;  %v1076_v17 = vld [vmem:[#allocation3 + $0x6f] sm:$0xff]  ;;  %v1077_v18 = vld [vmem:[#allocation3 + $0x77] sm:$0xff]  ;;  %v1369_v32 = vld [vmem:[#allocation3 + $0x9f] sm:$0xff] }
 0x2bf   : > { %v1347_v31 = vsel %vm3887_vm7, %v3954_v22, 0  ;;  %v921_v27 = vand.u32 15, %v835_v63  ;;  %v4700_v10 = vsel %vm4131_vm3, 4294967295, %v4699_v10  ;;  %v4170_v60 = vpack.c.bf16 %v1229_v40, %v1228_v35 }
 0x2c0   : > { %1426 = vrot.lane.b32.xlu0 %v1347_v31, %s3421_s29  ;;  %v1224_v31 = vld [vmem:[#allocation3 + $0x51] sm:$0xff]  ;;  %vm4101_vm12 = vcmp.ge.s32.totalorder %v928_v41, 1  ;;  %v4179_v0 = vpack.c.bf16 %v1079_v36, %v1078_v45  ;;  %v4715_v40 = vmov 0  ;;  %v1337_v47 = vsel %vm4001_vm6, %v3942_v15, 0 }
 0x2c1   : > { %vm4089_vm9 = vcmp.lt.s32.totalorder %v921_v27, 15  ;;  %vm1132_vm15 = vmpackc.low %vm4101_vm12, %vm4101_vm12  ;;  %v1207_v27 = vld [vmem:[#allocation3 + $0x88] sm:$0xff]  ;;  %v1358_v36 = vld [vmem:[#allocation3 + $0x91] sm:$0xff]  ;;  %v1387_v29 = vsel %vm4001_vm6, %v4033_v12, 0  ;;  %v1389_v14 = vsel %vm4096_vm10, %v4128_v3, 0 }
 0x2c2   : > { %1450 = vrot.lane.b32.xlu1 %v1361_v33, %s3421_s29  ;;  %v1225_v33 = vld [vmem:[#allocation3 + $0x59] sm:$0xff]  ;;  %vm1283_vm14 = vmpackc.low %vm4089_vm9, %vm4089_vm9  ;;  %vm4154_vm9 = vcmp.ne.s16.totalorder %v2568_v19, 0  ;;  %v4167_v58 = vpack.c.bf16 %v1207_v27, %v1206_v26 }
 0x2c3   : > { %v4084_v49 = vpack.c.bf16 %v1225_v33, %v1224_v31  ;;  %v1299_v20 = vsel %vm1283_vm14, 65537, %v3423_v25  ;;  %v1365_v31 = vsel %vm4131_vm3, %v4128_v3, 0  ;;  %v4151_v33 = vpack.c.bf16 %v1077_v18, %v1076_v17  ;;  %vm1285_vm12 = vmpackc.low %vm4139_vm8, %vm4139_vm8  ;;  %v3117_v15 = vld [vmem:[#allocation8 + $0x118] sm:$0xff]  }
 0x2c4   : > { %1408 = vrot.lane.b32.xlu0 %v3976_v38, %s3421_s29  ;;  %v2576_v41 = vcombine.low %v3873_v28, %v1299_v20  ;;  %v1301_v46 = vsel %vm1285_vm12, 65537, %v3423_v25 }
 0x2c5   : > { %v1352_v61 = vsel %vm4154_vm9, %v4151_v33, 0  ;;  %v2577_v17 = vcombine.low %v3873_v28, %v1301_v46  ;;  %v4717_v46 = vmov 0 }
 0x2c6   : > { %1428 = vrot.lane.b32.xlu1 %v1348_v55, %s3421_s29  ;;  %v1350_v55 = vsel %vm4073_vm4, %v4066_v30, 0 }
 0x2c8   : > { %1404 = vrot.lane.b32.xlu0 %v3995_v56, %s3421_s29 }
 0x2ca   : > { %1452 = vrot.lane.b32.xlu1 %v1362_v6, %s3421_s29  ;;  %v1364_v6 = vsel %vm4096_vm10, %v4084_v49, 0 }
 0x2cc   : > { %1410 = vrot.lane.b32.xlu0 %v4019_v54, %s3421_s29 }
 0x2ce   : > { %1430 = vrot.lane.b32.xlu1 %v1349_v21, %s3421_s29  ;;  %v942_v21 = vand.u32 15, %v838_v2  ;;  %v1231_v2 = vld [vmem:[#allocation3 + $0x89] sm:$0xff] }
 0x2cf   : > { %v4204_v20 = vpack.c.bf16 %v1231_v2, %v1230_v48  ;;  %v1216_v48 = vld [vmem:[#allocation3 + $0x11] sm:$0xff]  ;;  %v1217_v2 = vld [vmem:[#allocation3 + $0x19] sm:$0xff] }
 0x2d0   : > { %1454 = vrot.lane.b32.xlu0 %v1363_v23, %s3421_s29  ;;  %v1148_v23 = vsel %vm1132_vm15, 65537, %v3423_v25  ;;  %vm4162_vm14 = vcmp.ge.s32.totalorder %v942_v21, 1  ;;  %vm4175_vm15 = vcmp.ne.s16.totalorder %v2576_v41, 0  ;;  %v1344_v21 = vld [vmem:[#allocation3 + $0x8f] sm:$0xff] }
 0x2d1   : > { %v2569_v50 = vcombine.low %v1148_v23, %v3873_v28  ;;  %vm1134_vm8 = vmpackc.low %vm4162_vm14, %vm4162_vm14  ;;  %v1366_v5 = vsel %vm4175_vm15, %v4170_v60, 0  ;;  %v1345_v23 = vld [vmem:[#allocation3 + $0x97] sm:$0xff]  ;;  %vm4214_vm14 = vcmp.ne.s16.totalorder %v2577_v17, 0  ;;  %v1381_v41 = vld [vmem:[#allocation3 + $0xa8] sm:$0xff] }
 0x2d2   : > { %1412 = vrot.lane.b32.xlu1 %v4079_v34, %s3421_s29  ;;  %v1150_v18 = vsel %vm1134_vm8, 65537, %v3423_v25  ;;  %v4218_v27 = vpack.c.bf16 %v1345_v23, %v1344_v21  ;;  %v1367_v35 = vsel %vm4214_vm14, %v4204_v20, 0 }
 0x2d3   : > { %vm4185_vm0 = vcmp.ne.s16.totalorder %v2569_v50, 0  ;;  %v1359_v50 = vld [vmem:[#allocation3 + $0x99] sm:$0xff] }
 0x2d4   : > { %1432 = vrot.lane.b32.xlu0 %v1350_v55, %s3421_s29  ;;  %v949_v55 = vand.u32 15, %v839_v7  ;;  %v1356_v7 = vld [vmem:[#allocation3 + $0x98] sm:$0xff]  ;;  %v1353_v19 = vsel %vm4185_vm0, %v4179_v0, 0 }
 0x2d6   : > { %1456 = vrot.lane.b32.xlu1 %v1364_v6, %s3421_s29  ;;  %vm4189_vm3 = vcmp.lt.s32.totalorder %v949_v55, 15  ;;  %v1355_v6 = vld [vmem:[#allocation3 + $0x90] sm:$0xff]  ;;  %v1382_v55 = vpack.c.bf16 %v1381_v41, %v1380_v53 }
 0x2d7   : > { %vm1287_vm12 = vmpackc.low %vm4189_vm3, %vm4189_vm3  ;;  %v4210_v24 = vpack.c.bf16 %v1356_v7, %v1355_v6  ;;  %v1232_v6 = vpack.c.bf16 %v1217_v2, %v1216_v48 }
 0x2d8   : > { %1414 = vrot.lane.b32.xlu0 %v4117_v9, %s3421_s29 }
 0x2da   : > { %1434 = vrot.lane.b32.xlu1 %v1351_v16, %s3421_s29  ;;  %v2570_v16 = vcombine.low %v1150_v18, %v3873_v28 }
 0x2dc   : > { %1458 = vrot.lane.b32.xlu0 %v1365_v31, %s3421_s29  ;;  %v1303_v31 = vsel %vm1287_vm12, 65537, %v3423_v25  ;;  %vm4226_vm3 = vcmp.ne.s16.totalorder %v2570_v16, 0  ;;  %vm4719_vm12 = vcmask 523264   ;;  %v3115_v16 = vld [vmem:[#allocation8 + $0x108] sm:$0xff]  }
 0x2dd   : > { %v4716_v40 = vsel %vm4226_vm3, 4294967295, %v4715_v40  ;;  %v2578_v45 = vcombine.low %v3873_v28, %v1303_v31  ;;  %v1354_v25 = vsel %vm4226_vm3, %v4218_v27, 0  ;;  %vm4720_vm3 = vmmov %vm4719_vm12 }
 0x2de   : > { %1416 = vrot.lane.b32.xlu1 %v4167_v58, %s3421_s29 }
 0x2df   : > { %vm4238_vm8 = vcmp.ne.s16.totalorder %v2578_v45, 0 }
 0x2e0   : > { %1436 = vrot.lane.b32.xlu0 %v1352_v61, %s3421_s29  ;;  %v4235_v61 = vpack.c.bf16 %v1359_v50, %v1358_v36  ;;  %v4718_v46 = vsel %vm4238_vm8, 4294967295, %v4717_v46 }
 0x2e2   : > { %1460 = vrot.lane.b32.xlu1 %v1366_v5, %s3421_s29  ;;  %v1368_v28 = vsel %vm4238_vm8, %v4235_v61, 0  ;;  %v1064_v5 = vld [vmem:[#allocation3 + $0xf] sm:$0xff]  ;;  %vm4721_vm8 = vmmov %vm4720_vm3 }
 0x2e3   : > { %v1080_v7 = vpack.c.bf16 %v1065_v4, %v1064_v5 }
 0x2e4   : > { %1438 = vrot.lane.b32.xlu0 %v1353_v19, %s3421_s29  ;;  %v1336_v19 = vsel %vm3957_vm1, %v1232_v6, 0 }
 0x2e5   : > { %v1184_v21 = vsel %vm3887_vm7, %v1080_v7, 0  ;;  %vm4722_vm7 = vmmov %vm4720_vm3  ;;  %v1186_v7 = vsel %vm4029_vm11, %v3881_v44, 0  ;;  %v1339_v44 = vsel %vm4096_vm10, %v4033_v12, 0  ;;  %v1384_v12 = vld [vmem:[#allocation3 + $0xa9] sm:$0xff] }
 0x2e6   : > { %1468 = vrot.lane.b32.xlu1 %v4210_v24, %s3421_s29 }
 0x2e8   : > { %1462 = vrot.lane.b32.xlu0 %v1367_v35, %s3421_s29  ;;  %v1373_v35 = vsel %vm3986_vm5, %v4021_v8, 0 }
 0x2ea   : > { %1440 = vrot.lane.b32.xlu1 %v1354_v25, %s3421_s29  ;;  %v3116_v25 = vld [vmem:[#allocation8 + $0x110] sm:$0xff]  }
 0x2ec   : > { %1470 = vrot.lane.b32.xlu0 %v1382_v55, %s3421_s29 }
 0x2ee   : > { %1464 = vrot.lane.b32.xlu1 %v1368_v28, %s3421_s29  ;;  %v1185_v28 = vsel %vm3986_vm5, %v3954_v22, 0  ;;  %v1338_v22 = vsel %vm4040_vm13, %v3997_v42, 0  ;;  %vm4725_vm5 = vmmov %vm4720_vm3  ;;  %s3424_s29 = smov [#allocation10]  }
 0x2ef   : > { %s3308_s20 = sshll.u32 %s3424_s29, 4  ;;  %s3309_s20 = int_to_ptr.vmem [resolvable:$false] %s3308_s20 }
 0x2f0   : > { %s3310_s4 = scalar_lea.vmem %s3309_s20, 4096  ;;  %p3311_p3 = scmp.lt.s32.totalorder %s4544_s18, %s3309_s20 }
 0x330   : > { %v1403_v17 = vpop.permute.xlu1 %1402 }
 0x331   : > { %v1474_v31 = vsel %vm4720_vm3, %v1184_v21, %v1403_v17 }
 0x332   : > { %v1427_v18 = vpop.permute.xlu0 %1426 }
 0x333   : > { %v1506_v23 = vsel %vm4719_vm12, %v1336_v19, %v1427_v18  ;;  %vm4724_vm12 = vmmov %vm4720_vm3  ;;  %v1375_v18 = vsel %vm4073_vm4, %v4119_v13, 0 }
 0x334   : > { %1945 = vmatprep.mubr.bf16.mxu0 %v1506_v23  ;;  %v1451_v41 = vpop.permute.xlu1 %1450 }
 0x335   : > { %1946 = vmatmul.mubr.bf16.vlgmr.msra.gmra.mrb[16].mxu0 %v1474_v31  ;;  %v1538_v45 = vsel %vm4721_vm8, %v3995_v56, %v1451_v41  ;;  %vm4723_vm8 = vmmov %vm4720_vm3  ;;  %v1376_v41 = vsel %vm4124_vm2, %v4151_v33, 0 }
 0x336   : > { %v1409_v36 = vpop.permute.xlu0 %1408  ;;  %2870 = vmatpush3.bf16.msra.mxu0 %v3925_v51  ;;  %2043 = vmatmul.mubr.bf16.vlgmr.msra.gmra.mrb[4].mxu1 %v1538_v45 }
 0x337   : > { %v1572_v50 = vsel %vm4722_vm7, %v1373_v35, %v1409_v36  ;;  %2871 = vmatprep.subr.bf16.mxu0 %v3115_v16  ;;  %2897 = vmatpush3.bf16.msra.mxu1 %v3925_v51  ;;  %v1374_v51 = vsel %vm4029_vm11, %v4066_v30, 0  ;;  %vm4726_vm7 = vmmov %vm4720_vm3 }
 0x338   : > { %2050 = vmatprep.mubr.bf16.mxu1 %v1572_v50  ;;  %v1429_v53 = vpop.permute.xlu1 %1428  ;;  %2894 = vmatprep.subr.bf16.mxu1 %v3115_v16  ;;  %vm4728_vm11 = vmmov %vm4720_vm3 }
 0x339   : > { %v1510_v55 = vsel %vm4720_vm3, %v1337_v47, %v1429_v53 }
 0x33a   : > { %v1405_v56 = vpop.permute.xlu0 %1404  ;;  %2872 = vmatpush3.bf16.msra.mxu0 %v3115_v16  ;;  %1953 = vmatprep.mubr.bf16.mxu0 %v1510_v55  ;;  %v1341_v55 = vsel %vm4175_vm15, %v4128_v3, 0 }
 0x33b   : > { %v1478_v48 = vsel %vm4723_vm8, %v1185_v28, %v1405_v56  ;;  %2873 = vmatprep.subr.bf16.mxu0 %v3116_v25  ;;  %2898 = vmatpush3.bf16.msra.mxu1 %v3115_v16  ;;  %vm4727_vm8 = vmmov %vm4720_vm3  ;;  %v1377_v28 = vsel %vm4154_vm9, %v4179_v0, 0 }
 0x33c   : > { %v1453_v2 = vpop.permute.xlu1 %1452  ;;  %2895 = vmatprep.subr.bf16.mxu1 %v3116_v25  ;;  %v1482_v21 = vsel %vm4727_vm8, %v1186_v7, %v3892_v39  ;;  %v1187_v39 = vsel %vm4073_vm4, %v4021_v8, 0  ;;  %vm4732_vm8 = vmmov %vm4720_vm3 }
 0x33d   : > { %1954 = vmatmul.mubr.bf16.gmra.mrb[20].mxu0 %v1478_v48  ;;  %v1542_v4 = vsel %vm4724_vm12, %v3848_v37, %v1453_v2  ;;  %vm4729_vm12 = vmmov %vm4720_vm3  ;;  %v1486_v50 = vsel %vm4720_vm3, %v1187_v39, %v1409_v36 }
 0x33e   : > { %v1411_v5 = vpop.permute.xlu0 %1410  ;;  %2874 = vmatpush3.bf16.msra.mxu0 %v3116_v25  ;;  %2051 = vmatmul.mubr.bf16.gmra.mrb[8].mxu1 %v1542_v4  ;;  %vm4734_vm4 = vmmov %vm4720_vm3 }
 0x33f   : > { %v1575_v52 = vsel %vm4725_vm5, %v1374_v51, %v1411_v5  ;;  %2875 = vmatprep.subr.bf16.mxu0 %v3117_v15  ;;  %2899 = vmatpush3.bf16.msra.mxu1 %v3116_v25  ;;  %vm4730_vm5 = vnez %v4700_v10  ;;  %v1391_v10 = vsel %vm4175_vm15, %v4204_v20, 0 }
 0x340   : > { %2058 = vmatprep.mubr.bf16.mxu1 %v1575_v52  ;;  %v1431_v6 = vpop.permute.xlu1 %1430  ;;  %2896 = vmatprep.subr.bf16.mxu1 %v3117_v15  ;;  %v1340_v45 = vsel %vm4730_vm5, %v4084_v49, 0  ;;  %v1390_v39 = vsel %vm4730_vm5, %v4170_v60, 0 }
 0x341   : > { %v1514_v37 = vsel %vm4726_vm7, %v1338_v22, %v1431_v6  ;;  %vm4731_vm7 = vmmov %vm4720_vm3  ;;  %v1189_v22 = vsel %vm4154_vm9, %v4119_v13, 0  ;;  %vm4741_vm9 = vnez %v4718_v46 }
 0x342   : > { %v1455_v17 = vpop.permute.xlu0 %1454  ;;  %2876 = vmatpush3.bf16.msra.mxu0 %v3117_v15  ;;  %1961 = vmatprep.mubr.bf16.mxu0 %v1514_v37  ;;  %v1343_v13 = vsel %vm4741_vm9, %v4204_v20, 0  ;;  %v4389_v20 = vld [vmem:[%s4606_s5] ss:$0 sm:$0xff] }
 0x343   : > { %v1546_v19 = vsel %vm4720_vm3, %v3976_v38, %v1455_v17  ;;  %2900 = vmatpush3.bf16.msra.mxu1 %v3117_v15 }
 0x344   : > { %v1413_v11 = vpop.permute.xlu1 %1412 }
 0x345   : > { %1962 = vmatmul.mubr.bf16.gmra.mrb[24].mxu0 %v1482_v21  ;;  %v1578_v16 = vsel %vm4728_vm11, %v1375_v18, %v1413_v11  ;;  %vm4733_vm11 = vmmov %vm4720_vm3  ;;  %v1370_v18 = vld [vmem:[#allocation3 + $0xa7] sm:$0xff] }
 0x346   : > { %v1433_v23 = vpop.permute.xlu0 %1432  ;;  %2059 = vmatmul.mubr.bf16.gmra.mrb[12].mxu1 %v1546_v19  ;;  %v1371_v19 = vpack.c.bf16 %v1370_v18, %v1369_v32 }
 0x347   : > { %v1518_v31 = vsel %vm4729_vm12, %v1339_v44, %v1433_v23  ;;  %2066 = vmatprep.mubr.bf16.mxu1 %v1578_v16  ;;  %vm4735_vm12 = vmmov %vm4720_vm3 }
 0x348   : > { %1969 = vmatprep.mubr.bf16.mxu0 %v1518_v31  ;;  %v1457_v35 = vpop.permute.xlu1 %1456 }
 0x349   : > { %v1550_v47 = vsel %vm4731_vm7, %v4019_v54, %v1457_v35  ;;  %v1188_v54 = vsel %vm4124_vm2, %v4066_v30, 0  ;;  %vm4736_vm7 = vmmov %vm4720_vm3  ;;  %v1342_v30 = vsel %vm4214_vm14, %v4170_v60, 0  ;;  %v1392_v60 = vsel %vm4214_vm14, %v4235_v61, 0 }
 0x34a   : > { %v1415_v38 = vpop.permute.xlu0 %1414  ;;  %v1490_v51 = vsel %vm4736_vm7, %v1188_v54, %v1411_v5  ;;  %vm4737_vm2 = vmmov %vm4720_vm3 }
 0x34b   : > { %v1581_v53 = vsel %vm4732_vm8, %v1376_v41, %v1415_v38  ;;  %vm4738_vm8 = vmmov %vm4737_vm2 }
 0x34c   : > { %v1435_v25 = vpop.permute.xlu1 %1434  ;;  %vm4743_vm7 = vmmov %vm4737_vm2 }
 0x34d   : > { %1970 = vmatmul.mubr.bf16.gmra.mrb[28].mxu0 %v1486_v50  ;;  %v1522_v8 = vsel %vm4733_vm11, %v1340_v45, %v1435_v25  ;;  %vm4739_vm11 = vmmov %vm4737_vm2 }
 0x34e   : > { %v1459_v43 = vpop.permute.xlu0 %1458  ;;  %2067 = vmatmul.mubr.bf16.gmra.mrb[16].mxu1 %v1550_v47  ;;  %1977 = vmatprep.mubr.bf16.mxu0 %v1522_v8  ;;  %v1494_v7 = vsel %vm4739_vm11, %v1189_v22, %v1413_v11 }
 0x34f   : > { %2074 = vmatprep.mubr.bf16.mxu1 %v1581_v53  ;;  %v1554_v15 = vsel %vm4735_vm12, %v4079_v34, %v1459_v43  ;;  %v1378_v34 = vsel %vm4185_vm0, %v4218_v27, 0  ;;  %vm4742_vm12 = vmmov %vm4737_vm2 }
 0x350   : > { %v1417_v56 = vpop.permute.xlu1 %1416 }
 0x351   : > { %v1584_v2 = vsel %vm4720_vm3, %v1377_v28, %v1417_v56  ;;  %vm4744_vm3 = vmmov %vm4737_vm2 }
 0x352   : > { %v1437_v36 = vpop.permute.xlu0 %1436 }
 0x353   : > { %v1526_v48 = vsel %vm4734_vm4, %v1341_v55, %v1437_v36  ;;  %vm4740_vm4 = vmmov %vm4737_vm2 }
 0x354   : > { %v1461_v4 = vpop.permute.xlu1 %1460 }
 0x355   : > { %1978 = vmatmul.mubr.bf16.gmra.mrb[32].mxu0 %v1490_v51  ;;  %v1558_v52 = vsel %vm4738_vm8, %v4117_v9, %v1461_v4  ;;  %v1190_v9 = vsel %vm4185_vm0, %v4151_v33, 0  ;;  %vm4746_vm8 = vmmov %vm4744_vm3 }
 0x356   : > { %1985 = vmatprep.mubr.bf16.mxu0 %v1526_v48  ;;  %2075 = vmatmul.mubr.bf16.gmra.mrb[20].mxu1 %v1554_v15  ;;  %v1439_v63 = vpop.permute.xlu0 %1438  ;;  %v1498_v23 = vsel %vm4744_vm3, %v1190_v9, %v1415_v38  ;;  %vm4747_vm0 = vmmov %vm4744_vm3 }
 0x357   : > { %2082 = vmatprep.mubr.bf16.mxu1 %v1584_v2  ;;  %v1530_v5 = vsel %vm4737_vm2, %v1342_v30, %v1439_v63  ;;  %vm4745_vm2 = vnez %v4716_v40  ;;  %vm4748_vm11 = vmmov %vm4747_vm0 }
 0x358   : > { %v1469_v6 = vpop.permute.xlu1 %1468  ;;  %v1379_v16 = vsel %vm4745_vm2, %v1371_v19, 0  ;;  %v1191_v33 = vsel %vm4745_vm2, %v4179_v0, 0  ;;  %vm4752_vm5 = vmmov %vm4747_vm0 }
 0x359   : > { %v1588_v37 = vsel %vm4740_vm4, %v1378_v34, %v1469_v6  ;;  %v1502_v35 = vsel %vm4747_vm0, %v1191_v33, %v1417_v56  ;;  %vm4749_vm4 = vmmov %vm4747_vm0 }
 0x35a   : > { %v1463_v17 = vpop.permute.xlu0 %1462  ;;  %vm4754_vm6 = vmmov %vm4747_vm0 }
 0x35b   : > { %v1562_v44 = vsel %vm4743_vm7, %v4167_v58, %v1463_v17  ;;  %v1386_v58 = vsel %vm3957_vm1, %v3997_v42, 0  ;;  %v1388_v42 = vsel %vm4040_vm13, %v4084_v49, 0  ;;  %vm4751_vm1 = vmmov %vm4747_vm0  ;;  %v1385_v49 = vpack.c.bf16 %v1384_v12, %v1383_v59 }
 0x35c   : > { %v1441_v27 = vpop.permute.xlu1 %1440  ;;  %vm4753_vm7 = vmmov %vm4747_vm0 }
 0x35d   : > { %1986 = vmatmul.mubr.bf16.gmra.mrb[36].mxu0 %v1494_v7  ;;  %v1534_v21 = vsel %vm4742_vm12, %v1343_v13, %v1441_v27  ;;  %vm4750_vm12 = vmmov %vm4747_vm0  ;;  %v1393_v62 = vsel %vm4741_vm9, %v1385_v49, 0 }
 0x35e   : > { %1993 = vmatprep.mubr.bf16.mxu0 %v1530_v5  ;;  %2083 = vmatmul.mubr.bf16.gmra.mrb[24].mxu1 %v1558_v52  ;;  %v1471_v11 = vpop.permute.xlu0 %1470  ;;  %vm4755_vm13 = vmmov %vm4747_vm0 }
 0x35f   : > { %2090 = vmatprep.mubr.bf16.mxu1 %v1588_v37  ;;  %v1592_v31 = vsel %vm4746_vm8, %v1379_v16, %v1471_v11  ;;  %vm4756_vm15 = vmmov %vm4747_vm0 }
 0x360   : > { %v1465_v1 = vpop.permute.xlu1 %1464 }
 0x361   : > { %v1566_v38 = vsel %vm4748_vm11, %v4210_v24, %v1465_v1 }
 0x365   : > { %1994 = vmatmul.mubr.bf16.gmra.mrb[40].mxu0 %v1498_v23 }
 0x366   : > { %2001 = vmatprep.mubr.bf16.mxu0 %v1534_v21  ;;  %2091 = vmatmul.mubr.bf16.gmra.mrb[28].mxu1 %v1562_v44 }
 0x367   : > { %2098 = vmatprep.mubr.bf16.mxu1 %v1592_v31 }
 0x36d   : > { %2002 = vmatmul.mubr.bf16.gmra.mrb[44].mxu0 %v1502_v35 }
 0x36e   : > { %2877 = vmatprep.mubr.msk.bf16.mxu0 %vm4749_vm4, %v1386_v58  ;;  %2099 = vmatmul.mubr.bf16.gmra.mrb[32].mxu1 %v1566_v38 }
 0x36f   : > { %2885 = vmatprep.mubr.msk.bf16.mxu1 %vm4750_vm12, %v1390_v39 }
 0x375   : > { %2878 = vmatmul.mubr.msk.bf16.vlgmr.msra.gmra.mrb[48].mxu0 %vm4751_vm1, %v1387_v29 }
 0x376   : > { %2881 = vmatprep.mubr.msk.bf16.mxu0 %vm4752_vm5, %v1388_v42  ;;  %2886 = vmatmul.mubr.msk.bf16.vlgmr.msra.gmra.mrb[36].mxu1 %vm4753_vm7, %v1391_v10 }
 0x377   : > { %2889 = vmatprep.mubr.msk.bf16.mxu1 %vm4754_vm6, %v1392_v60 }
 0x37d   : > { %2882 = vmatmul.mubr.msk.bf16.gmra.mrb[52].mxu0 %vm4755_vm13, %v1389_v14 }
 0x37e   : > { %2890 = vmatmul.mubr.msk.bf16.gmra.mrb[40].mxu1 %vm4756_vm15, %v1393_v62 }
 0x408   : > { %v2693_v0 = vpop.f32.mrb[16].mxu0 }
 0x409   : > { %v2694_v24 = vpop.f32.mrb[17].mxu0  ;;  %v2757_v61 = vpop.f32.mrb[4].mxu1 }
 0x40a   : > { %v2695_v26 = vadd.f32 %v2694_v24, %v2693_v0  ;;  %v2696_v40 = vpop.f32.mrb[18].mxu0  ;;  %v2758_v3 = vpop.f32.mrb[5].mxu1 }
 0x40b   : > { %v2697_v57 = vpop.f32.mrb[19].mxu0  ;;  %v2759_v47 = vadd.f32 %v2758_v3, %v2757_v61  ;;  %v2760_v46 = vpop.f32.mrb[6].mxu1 }
 0x40c   : > { %v1948_v41 = vadd.f32 %v2695_v26, %v4389_v20  ;;  %v2698_v45 = vadd.f32 %v2697_v57, %v2696_v40  ;;  %v2761_v50 = vpop.f32.mrb[7].mxu1 }
 0x40d   : > { %v2762_v53 = vadd.f32 %v2761_v50, %v2760_v46 }
 0x40e   : > { %v1951_v25 = vadd.f32 %v2698_v45, %v4389_v20  ;;  %v4393_v8 = vadd.f32 %v2759_v47, %v1948_v41 }
 0x410   : > { %v2699_v43 = vpop.f32.mrb[20].mxu0  ;;  %v4395_v55 = vadd.f32 %v2762_v53, %v1951_v25 }
 0x411   : > { %v2700_v56 = vpop.f32.mrb[21].mxu0  ;;  %v2763_v28 = vpop.f32.mrb[8].mxu1 }
 0x412   : > { %v2701_v54 = vadd.f32 %v2700_v56, %v2699_v43  ;;  %v2702_v36 = vpop.f32.mrb[22].mxu0  ;;  %v2764_v15 = vpop.f32.mrb[9].mxu1 }
 0x413   : > { %v2703_v48 = vpop.f32.mrb[23].mxu0  ;;  %v2765_v4 = vadd.f32 %v2764_v15, %v2763_v28  ;;  %v2766_v30 = vpop.f32.mrb[10].mxu1 }
 0x414   : > { %v1956_v51 = vadd.f32 %v2701_v54, %v4389_v20  ;;  %v2704_v2 = vadd.f32 %v2703_v48, %v2702_v36  ;;  %v2767_v63 = vpop.f32.mrb[11].mxu1 }
 0x415   : > { %v2768_v34 = vadd.f32 %v2767_v63, %v2766_v30 }
 0x416   : > { %v1959_v22 = vadd.f32 %v2704_v2, %v4389_v20  ;;  %v4399_v5 = vadd.f32 %v2765_v4, %v1956_v51 }
 0x418   : > { %v2705_v52 = vpop.f32.mrb[24].mxu0  ;;  %v4401_v6 = vadd.f32 %v2768_v34, %v1959_v22 }
 0x419   : > { %v2706_v7 = vpop.f32.mrb[25].mxu0  ;;  %v2769_v18 = vpop.f32.mrb[12].mxu1 }
 0x41a   : > { %v2707_v37 = vadd.f32 %v2706_v7, %v2705_v52  ;;  %v2708_v17 = vpop.f32.mrb[26].mxu0  ;;  %v2770_v32 = vpop.f32.mrb[13].mxu1 }
 0x41b   : > { %v2709_v13 = vpop.f32.mrb[27].mxu0  ;;  %v2771_v19 = vadd.f32 %v2770_v32, %v2769_v18  ;;  %v2772_v21 = vpop.f32.mrb[14].mxu1 }
 0x41c   : > { %v1964_v9 = vadd.f32 %v2707_v37, %v4389_v20  ;;  %v2710_v27 = vadd.f32 %v2709_v13, %v2708_v17  ;;  %v2773_v44 = vpop.f32.mrb[15].mxu1 }
 0x41d   : > { %v2774_v23 = vadd.f32 %v2773_v44, %v2772_v21 }
 0x41e   : > { %v1967_v11 = vadd.f32 %v2710_v27, %v4389_v20  ;;  %v4405_v16 = vadd.f32 %v2771_v19, %v1964_v9 }
 0x420   : > { %v2711_v31 = vpop.f32.mrb[28].mxu0  ;;  %v4407_v33 = vadd.f32 %v2774_v23, %v1967_v11 }
 0x421   : > { %v2712_v1 = vpop.f32.mrb[29].mxu0  ;;  %v2775_v39 = vpop.f32.mrb[16].mxu1 }
 0x422   : > { %v2713_v58 = vadd.f32 %v2712_v1, %v2711_v31  ;;  %v2714_v35 = vpop.f32.mrb[30].mxu0  ;;  %v2776_v29 = vpop.f32.mrb[17].mxu1 }
 0x423   : > { %v2715_v38 = vpop.f32.mrb[31].mxu0  ;;  %v2777_v60 = vadd.f32 %v2776_v29, %v2775_v39  ;;  %v2778_v59 = vpop.f32.mrb[18].mxu1 }
 0x424   : > { %v1972_v42 = vadd.f32 %v2713_v58, %v4389_v20  ;;  %v2716_v10 = vadd.f32 %v2715_v38, %v2714_v35  ;;  %v2779_v12 = vpop.f32.mrb[19].mxu1 }
 0x425   : > { %v2780_v49 = vadd.f32 %v2779_v12, %v2778_v59 }
 0x426   : > { %v1975_v14 = vadd.f32 %v2716_v10, %v4389_v20  ;;  %v4411_v62 = vadd.f32 %v2777_v60, %v1972_v42 }
 0x428   : > { %v2717_v0 = vpop.f32.mrb[32].mxu0  ;;  %v4413_v24 = vadd.f32 %v2780_v49, %v1975_v14 }
 0x429   : > { %v2718_v26 = vpop.f32.mrb[33].mxu0  ;;  %v2781_v57 = vpop.f32.mrb[20].mxu1 }
 0x42a   : > { %v2719_v40 = vadd.f32 %v2718_v26, %v2717_v0  ;;  %v2720_v61 = vpop.f32.mrb[34].mxu0  ;;  %v2782_v41 = vpop.f32.mrb[21].mxu1 }
 0x42b   : > { %v2721_v3 = vpop.f32.mrb[35].mxu0  ;;  %v2783_v46 = vadd.f32 %v2782_v41, %v2781_v57  ;;  %v2784_v50 = vpop.f32.mrb[22].mxu1 }
 0x42c   : > { %v1980_v45 = vadd.f32 %v2719_v40, %v4389_v20  ;;  %v2722_v47 = vadd.f32 %v2721_v3, %v2720_v61  ;;  %v2785_v25 = vpop.f32.mrb[23].mxu1 }
 0x42d   : > { %v2786_v43 = vadd.f32 %v2785_v25, %v2784_v50 }
 0x42e   : > { %v1983_v53 = vadd.f32 %v2722_v47, %v4389_v20  ;;  %v4417_v56 = vadd.f32 %v2783_v46, %v1980_v45 }
 0x430   : > { %v2723_v54 = vpop.f32.mrb[36].mxu0  ;;  %v4419_v36 = vadd.f32 %v2786_v43, %v1983_v53 }
 0x431   : > { %v2724_v28 = vpop.f32.mrb[37].mxu0  ;;  %v2787_v51 = vpop.f32.mrb[24].mxu1 }
 0x432   : > { %v2725_v48 = vadd.f32 %v2724_v28, %v2723_v54  ;;  %v2726_v15 = vpop.f32.mrb[38].mxu0  ;;  %v2788_v4 = vpop.f32.mrb[25].mxu1 }
 0x433   : > { %v2727_v2 = vpop.f32.mrb[39].mxu0  ;;  %v2789_v22 = vadd.f32 %v2788_v4, %v2787_v51  ;;  %v2790_v34 = vpop.f32.mrb[26].mxu1 }
 0x434   : > { %v1988_v30 = vadd.f32 %v2725_v48, %v4389_v20  ;;  %v2728_v63 = vadd.f32 %v2727_v2, %v2726_v15  ;;  %v2791_v52 = vpop.f32.mrb[27].mxu1 }
 0x435   : > { %v2792_v37 = vadd.f32 %v2791_v52, %v2790_v34 }
 0x436   : > { %v1991_v7 = vadd.f32 %v2728_v63, %v4389_v20  ;;  %v2085_v17 = vadd.f32 %v2789_v22, %v1988_v30 }
 0x438   : > { %v2729_v18 = vpop.f32.mrb[40].mxu0  ;;  %v2088_v13 = vadd.f32 %v2792_v37, %v1991_v7 }
 0x439   : > { %v2730_v32 = vpop.f32.mrb[41].mxu0  ;;  %v2793_v19 = vpop.f32.mrb[28].mxu1 }
 0x43a   : > { %v2731_v9 = vadd.f32 %v2730_v32, %v2729_v18  ;;  %v2732_v27 = vpop.f32.mrb[42].mxu0  ;;  %v2794_v44 = vpop.f32.mrb[29].mxu1 }
 0x43b   : > { %v2733_v21 = vpop.f32.mrb[43].mxu0  ;;  %v2795_v31 = vadd.f32 %v2794_v44, %v2793_v19  ;;  %v2796_v1 = vpop.f32.mrb[30].mxu1 }
 0x43c   : > { %v1996_v11 = vadd.f32 %v2731_v9, %v4389_v20  ;;  %v2734_v23 = vadd.f32 %v2733_v21, %v2732_v27  ;;  %v2797_v58 = vpop.f32.mrb[31].mxu1 }
 0x43d   : > { %v2798_v39 = vadd.f32 %v2797_v58, %v2796_v1 }
 0x43e   : > { %v1999_v35 = vadd.f32 %v2734_v23, %v4389_v20  ;;  %v4425_v38 = vadd.f32 %v2795_v31, %v1996_v11 }
 0x440   : > { %v2735_v29 = vpop.f32.mrb[44].mxu0  ;;  %v4427_v42 = vadd.f32 %v2798_v39, %v1999_v35 }
 0x441   : > { %v2736_v10 = vpop.f32.mrb[45].mxu0  ;;  %v2799_v12 = vpop.f32.mrb[32].mxu1 }
 0x442   : > { %v2737_v60 = vadd.f32 %v2736_v10, %v2735_v29  ;;  %v2738_v59 = vpop.f32.mrb[46].mxu0  ;;  %v2800_v49 = vpop.f32.mrb[33].mxu1 }
 0x443   : > { %v2739_v14 = vpop.f32.mrb[47].mxu0  ;;  %v2801_v40 = vadd.f32 %v2800_v49, %v2799_v12  ;;  %v2802_v61 = vpop.f32.mrb[34].mxu1 }
 0x444   : > { %v2004_v0 = vadd.f32 %v2737_v60, %v4389_v20  ;;  %v2740_v26 = vadd.f32 %v2739_v14, %v2738_v59  ;;  %v2803_v57 = vpop.f32.mrb[35].mxu1 }
 0x445   : > { %v2804_v41 = vadd.f32 %v2803_v57, %v2802_v61 }
 0x446   : > { %v2007_v3 = vadd.f32 %v2740_v26, %v4389_v20  ;;  %v2101_v45 = vadd.f32 %v2801_v40, %v2004_v0 }
 0x448   : > { %v2879_v47 = vpop.f32.mrb[48].mxu0  ;;  %v2104_v46 = vadd.f32 %v2804_v41, %v2007_v3 }
 0x449   : > { %v4432_v50 = vadd.f32 %v2879_v47, %v4399_v5  ;;  %v2141_v25 = vpop.f32.mrb[49].mxu0  ;;  %v2887_v54 = vpop.f32.mrb[36].mxu1 }
 0x44a   : > { %v4435_v53 = vadd.f32 %v2141_v25, %v4393_v8  ;;  %v2880_v43 = vpop.f32.mrb[50].mxu0  ;;  %v4441_v15 = vadd.f32 %v2887_v54, %v2085_v17  ;;  %v2173_v51 = vpop.f32.mrb[37].mxu1 }
 0x44b   : > { %v2626_v28 = vmul.f32 -1.442695, %v4432_v50  ;;  %v4439_v48 = vadd.f32 %v2880_v43, %v4401_v6  ;;  %v2144_v20 = vpop.f32.mrb[51].mxu0  ;;  %v4448_v4 = vadd.f32 %v2173_v51, %v4417_v56  ;;  %v2888_v8 = vpop.f32.mrb[38].mxu1 }
 0x44c   : > { %v2624_v2 = vmul.f32 -1.442695, %v4435_v53  ;;  %v4445_v5 = vadd.f32 %v2144_v20, %v4395_v55  ;;  %v2634_v63 = vmul.f32 -1.442695, %v4441_v15  ;;  %v4452_v6 = vadd.f32 %v2888_v8, %v2088_v13  ;;  %v2176_v22 = vpop.f32.mrb[39].mxu1  ;;  %v2318_v8 = vld [vmem:[%s3638_s19 + $0x10] sm:$0xff] }
 0x44d   : > { %3134 = vpow2.f32 %v2626_v28  ;;  %v2627_v30 = vmul.f32 -1.442695, %v4439_v48  ;;  %v2632_v52 = vmul.f32 -1.442695, %v4448_v4  ;;  %v4457_v55 = vadd.f32 %v2176_v22, %v4419_v36 }
 0x44e   : > { %3136 = vpow2.f32 %v2624_v2  ;;  %v2625_v34 = vmul.f32 -1.442695, %v4445_v5  ;;  %v2635_v56 = vmul.f32 -1.442695, %v4452_v6 }
 0x44f   : > { %3138 = vpow2.f32 %v2627_v30  ;;  %v2633_v7 = vmul.f32 -1.442695, %v4457_v55 }
 0x450   : > { %3140 = vpow2.f32 %v2634_v63  ;;  %v2883_v37 = vpop.f32.mrb[52].mxu0 }
 0x451   : > { %3142 = vpow2.f32 %v2625_v34  ;;  %v4462_v17 = vadd.f32 %v2883_v37, %v4411_v62  ;;  %v2157_v18 = vpop.f32.mrb[53].mxu0  ;;  %v2891_v9 = vpop.f32.mrb[40].mxu1 }
 0x452   : > { %3144 = vpow2.f32 %v2632_v52  ;;  %v4465_v13 = vadd.f32 %v2157_v18, %v4405_v16  ;;  %v2884_v32 = vpop.f32.mrb[54].mxu0  ;;  %v4471_v19 = vadd.f32 %v2891_v9, %v2101_v45  ;;  %v2189_v44 = vpop.f32.mrb[41].mxu1  ;;  %v2316_v52 = vld [vmem:[%s3638_s19] sm:$0xff]  ;;  %v2319_v18 = vld [vmem:[%s3638_s19 + $0x18] sm:$0xff] }
 0x453   : > { %3146 = vpow2.f32 %v2635_v56  ;;  %v2630_v36 = vmul.f32 -1.442695, %v4462_v17  ;;  %v4469_v27 = vadd.f32 %v2884_v32, %v4413_v24  ;;  %v2160_v21 = vpop.f32.mrb[55].mxu0  ;;  %v4478_v16 = vadd.f32 %v2189_v44, %v4425_v38  ;;  %v2892_v23 = vpop.f32.mrb[42].mxu1 }
 0x454   : > { %3148 = vpow2.f32 %v2633_v7  ;;  %v2628_v62 = vmul.f32 -1.442695, %v4465_v13  ;;  %v4475_v11 = vadd.f32 %v2160_v21, %v4407_v33  ;;  %v2638_v24 = vmul.f32 -1.442695, %v4471_v19  ;;  %v2192_v58 = vpop.f32.mrb[43].mxu1  ;;  %v2326_v21 = vld [vmem:[%s3638_s19 + $0x50] sm:$0xff] }
 0x455   : > { %3150 = vpow2.f32 %v2630_v36  ;;  %v2631_v31 = vmul.f32 -1.442695, %v4469_v27  ;;  %v4482_v1 = vadd.f32 %v2892_v23, %v2104_v46  ;;  %v4486_v39 = vadd.f32 %v2192_v58, %v4427_v42  ;;  %v2317_v23 = vld [vmem:[%s3638_s19 + $0x8] sm:$0xff]  ;;  %v2324_v58 = vld [vmem:[%s3638_s19 + $0x40] sm:$0xff] }
 0x456   : > { %3152 = vpow2.f32 %v2628_v62  ;;  %v2629_v35 = vmul.f32 -1.442695, %v4475_v11  ;;  %v2636_v51 = vmul.f32 -1.442695, %v4478_v16 }
 0x457   : > { %v3135_v33 = vpop.eup %3134  ;;  %3154 = vpow2.f32 %v2631_v31  ;;  %v2639_v63 = vmul.f32 -1.442695, %v4482_v1  ;;  %v2637_v56 = vmul.f32 -1.442695, %v4486_v39 }
 0x458   : > { %v3137_v29 = vpop.eup %3136  ;;  %v2254_v38 = vadd.f32 1.0, %v3135_v33  ;;  %3156 = vpow2.f32 %v2638_v24 }
 0x459   : > { %v3139_v10 = vpop.eup %3138  ;;  %v2252_v60 = vadd.f32 1.0, %v3137_v29  ;;  %3158 = vpow2.f32 %v2629_v35 }
 0x45a   : > { %v3141_v59 = vpop.eup %3140  ;;  %3160 = vrcp.f32 %v2254_v38  ;;  %v2255_v12 = vadd.f32 1.0, %v3139_v10 }
 0x45b   : > { %v3143_v14 = vpop.eup %3142  ;;  %3162 = vrcp.f32 %v2252_v60  ;;  %v2262_v49 = vadd.f32 1.0, %v3141_v59  ;;  %v2325_v60 = vld [vmem:[%s3638_s19 + $0x48] sm:$0xff] }
 0x45c   : > { %v3145_v0 = vpop.eup %3144  ;;  %3164 = vrcp.f32 %v2255_v12  ;;  %v2253_v26 = vadd.f32 1.0, %v3143_v14  ;;  %v2322_v14 = vld [vmem:[%s3638_s19 + $0x30] sm:$0xff] }
 0x45d   : > { %v3147_v40 = vpop.eup %3146  ;;  %3166 = vrcp.f32 %v2262_v49  ;;  %v2260_v42 = vadd.f32 1.0, %v3145_v0 }
 0x45e   : > { %v3149_v61 = vpop.eup %3148  ;;  %3168 = vrcp.f32 %v2253_v26  ;;  %v2263_v57 = vadd.f32 1.0, %v3147_v40  ;;  %v2320_v26 = vld [vmem:[%s3638_s19 + $0x20] sm:$0xff] }
 0x45f   : > { %v3151_v3 = vpop.eup %3150  ;;  %3170 = vrcp.f32 %v2260_v42  ;;  %v2261_v41 = vadd.f32 1.0, %v3149_v61  ;;  %v2323_v61 = vld [vmem:[%s3638_s19 + $0x38] sm:$0xff] }
 0x460   : > { %v3153_v45 = vpop.eup %3152  ;;  %3172 = vrcp.f32 %v2263_v57  ;;  %v2258_v47 = vadd.f32 1.0, %v3151_v3 }
 0x461   : > { %v3155_v46 = vpop.eup %3154  ;;  %3174 = vrcp.f32 %v2261_v41  ;;  %v2256_v25 = vadd.f32 1.0, %v3153_v45  ;;  %v2330_v41 = vld [vmem:[%s3638_s19 + $0x70] sm:$0xff] }
 0x462   : > { %v3157_v43 = vpop.eup %3156  ;;  %3176 = vrcp.f32 %v2258_v47  ;;  %v2259_v54 = vadd.f32 1.0, %v3155_v46  ;;  %v2321_v46 = vld [vmem:[%s3638_s19 + $0x28] sm:$0xff] }
 0x463   : > { %v3159_v28 = vpop.eup %3158  ;;  %3178 = vrcp.f32 %v2256_v25  ;;  %v2266_v20 = vadd.f32 1.0, %v3157_v43 }
 0x464   : > { %v3161_v2 = vpop.eup %3160  ;;  %3180 = vrcp.f32 %v2259_v54  ;;  %v2257_v30 = vadd.f32 1.0, %v3159_v28 }
 0x465   : > { %v3163_v22 = vpop.eup %3162  ;;  %v2302_v34 = vmul.f32 %v3161_v2, %v4432_v50  ;;  %3182 = vrcp.f32 %v2266_v20 }
 0x466   : > { %v3165_v7 = vpop.eup %3164  ;;  %v2300_v37 = vmul.f32 %v3163_v22, %v4435_v53  ;;  %3184 = vrcp.f32 %v2257_v30  ;;  %v2331_v22 = vld [vmem:[%s3638_s19 + $0x78] sm:$0xff] }
 0x467   : > { %v3167_v32 = vpop.eup %3166  ;;  %v2334_v9 = vadd.f32 %v2318_v8, %v2302_v34  ;;  %v2303_v36 = vmul.f32 %v3165_v7, %v4439_v48  ;;  %3186 = vpow2.f32 %v2636_v51  ;;  %v2328_v8 = vld [vmem:[%s3638_s19 + $0x60] sm:$0xff] }
 0x468   : > { %v3169_v50 = vpop.eup %3168  ;;  %v2332_v44 = vadd.f32 %v2316_v52, %v2300_v37  ;;  %v2310_v62 = vmul.f32 %v3167_v32, %v4441_v15  ;;  %3188 = vpow2.f32 %v2639_v63  ;;  %v2327_v15 = vld [vmem:[%s3638_s19 + $0x58] sm:$0xff] }
 0x469   : > { %v3171_v53 = vpop.eup %3170  ;;  %2350 = vst [vmem:[%s3820_s26 + $0x10] sm:$0xff] %v2334_v9  ;;  %v2335_v31 = vadd.f32 %v2319_v18, %v2303_v36  ;;  %v2301_v24 = vmul.f32 %v3169_v50, %v4445_v5  ;;  %3190 = vpow2.f32 %v2637_v56  ;;  %v2329_v56 = vld [vmem:[%s3638_s19 + $0x68] sm:$0xff]  ;;  %s3304_s19 = scalar_lea.vmem %s4544_s18, 2048 }
 0x46a   : > { %v3173_v48 = vpop.eup %3172  ;;  %2348 = vst [vmem:[%s3820_s26] sm:$0xff] %v2332_v44  ;;  %v2342_v35 = vadd.f32 %v2326_v21, %v2310_v62  ;;  %v2308_v33 = vmul.f32 %v3171_v53, %v4448_v4  ;;  %p3305_p10 = scmp.ne.s32.totalorder %s4544_s18, %s3304_s19  ;;  %p3312_p7 = scmp.lt.s32.totalorder %s3310_s4, %s3304_s19 }
 0x46b   : > { %v3175_v29 = vpop.eup %3174  ;;  %2351 = vst [vmem:[%s3820_s26 + $0x18] sm:$0xff] %v2335_v31  ;;  %v2333_v38 = vadd.f32 %v2317_v23, %v2301_v24  ;;  %v2311_v10 = vmul.f32 %v3173_v48, %v4452_v6 }
 0x46c   : > { %v3177_v5 = vpop.eup %3176  ;;  %2358 = vst [vmem:[%s3820_s26 + $0x50] sm:$0xff] %v2342_v35  ;;  %v2340_v59 = vadd.f32 %v2324_v58, %v2308_v33  ;;  %v2309_v12 = vmul.f32 %v3175_v29, %v4457_v55  ;;  %p3306_p12 = pnand %p3305_p10, %p3567_p11  ;;  %p3313_p1 = por %p3312_p7, %p3311_p3 }
 0x46d   : > { %v3179_v49 = vpop.eup %3178  ;;  %2349 = vst [vmem:[%s3820_s26 + $0x8] sm:$0xff] %v2333_v38  ;;  %v2343_v4 = vadd.f32 %v2327_v15, %v2311_v10  ;;  %v2306_v0 = vmul.f32 %v3177_v5, %v4462_v17 }
 0x46e   : > { %v3181_v40 = vpop.eup %3180  ;;  %2356 = vst [vmem:[%s3820_s26 + $0x40] sm:$0xff] %v2340_v59  ;;  %v2341_v6 = vadd.f32 %v2325_v60, %v2309_v12  ;;  %v2304_v42 = vmul.f32 %v3179_v49, %v4465_v13  ;;  %p3307_p13 = pneg %p3306_p12 }
 0x46f   : > { %v3183_v57 = vpop.eup %3182  ;;  %2359 = vst [vmem:[%s3820_s26 + $0x58] sm:$0xff] %v2343_v4  ;;  %v2338_v55 = vadd.f32 %v2322_v14, %v2306_v0  ;;  %v2307_v3 = vmul.f32 %v3181_v40, %v4469_v27 }
 0x470   : > { %v3185_v45 = vpop.eup %3184  ;;  %2357 = vst [vmem:[%s3820_s26 + $0x48] sm:$0xff] %v2341_v6  ;;  %v2336_v17 = vadd.f32 %v2320_v26, %v2304_v42  ;;  %v2314_v47 = vmul.f32 %v3183_v57, %v4471_v19  ;;  %p3314_p2 = pnand %p3313_p1, %p3307_p13 }
 0x471   : > { %v3187_v25 = vpop.eup %3186  ;;  %2354 = vst [vmem:[%s3820_s26 + $0x30] sm:$0xff] %v2338_v55  ;;  %v2339_v13 = vadd.f32 %v2323_v61, %v2307_v3  ;;  %v2305_v43 = vmul.f32 %v3185_v45, %v4475_v11 }
 0x472   : > { %v3189_v54 = vpop.eup %3188  ;;  %2352 = vst [vmem:[%s3820_s26 + $0x20] sm:$0xff] %v2336_v17  ;;  %v2346_v27 = vadd.f32 %v2330_v41, %v2314_v47  ;;  %v2264_v28 = vadd.f32 1.0, %v3187_v25 }
 0x473   : > { %v3191_v20 = vpop.eup %3190  ;;  %2355 = vst [vmem:[%s3820_s26 + $0x38] sm:$0xff] %v2339_v13  ;;  %v2337_v51 = vadd.f32 %v2321_v46, %v2305_v43  ;;  %v2267_v2 = vadd.f32 1.0, %v3189_v54 }
 0x474   : > { %2362 = vst [vmem:[%s3820_s26 + $0x70] sm:$0xff] %v2346_v27  ;;  %3192 = vrcp.f32 %v2264_v28  ;;  %v2265_v19 = vadd.f32 1.0, %v3191_v20 }
 0x475   : > { %2353 = vst [vmem:[%s3820_s26 + $0x28] sm:$0xff] %v2337_v51  ;;  %3194 = vrcp.f32 %v2267_v2 }
 0x476   : > { %3196 = vrcp.f32 %v2265_v19 }
 0x47e   : > { %v3193_v11 = vpop.eup %3192 }
 0x47f   : > { %v3195_v30 = vpop.eup %3194  ;;  %v2312_v63 = vmul.f32 %v3193_v11, %v4478_v16 }
 0x480   : > { %v3197_v34 = vpop.eup %3196  ;;  %v2315_v52 = vmul.f32 %v3195_v30, %v4482_v1 }
 0x481   : > { %v2344_v7 = vadd.f32 %v2328_v8, %v2312_v63  ;;  %v2313_v37 = vmul.f32 %v3197_v34, %v4486_v39 }
 0x482   : > { %v2347_v18 = vadd.f32 %v2331_v22, %v2315_v52 }
 0x483   : > { %2360 = vst [vmem:[%s3820_s26 + $0x60] sm:$0xff] %v2344_v7  ;;  %v2345_v16 = vadd.f32 %v2329_v56, %v2313_v37 }
 0x484   : > { %2363 = vst [vmem:[%s3820_s26 + $0x78] sm:$0xff] %v2347_v18 }
 0x485   : > { %2361 = vst [vmem:[%s3820_s26 + $0x68] sm:$0xff] %v2345_v16 }
 0x486   : > { %3317 = shalt.err (!%p3314_p2)
}
 0x487   : > { %s3318_s26 = scalar_lea.hbm %s4542_s15, 2048  ;;  %s3322_s30 = scalar_lea.hbm %s4758_s9, 8192 }
 0x488   : > { %p3319_p4 = scmp.ne.s32.totalorder %s4542_s15, %s3318_s26  ;;  %p3323_p0 = scmp.lt.u32.totalorder %s4542_s15, %s4758_s9 }
 0x489   : > { %p3324_p6 = scmp.lt.u32.totalorder %s3322_s30, %s3318_s26  ;;  %p3326_p10 = scmp.lt.u32.totalorder %s3318_s26, %s4542_s15 }
 0x48a   : > { %p3320_p5 = pnand %p3319_p4, %p3567_p11 }
 0x48b   : > { %p3325_p8 = por %p3324_p6, %p3323_p0 }
 0x48c   : > { %p3321_p9 = pneg %p3320_p5 }
 0x48d   : > { %p3327_p12 = por %p3326_p10, %p3325_p8 }
 0x48f   : > { %p3328_p13 = pnand %p3327_p12, %p3321_p9 }
 0x491   : > { %3331 = shalt.err (!%p3328_p13)
}
 0x492   : > { %s3425_s17 = smov 128   ;;  %s3426_s8 = smov 8  }
 0x493   : > { %2907 = dma.vmem_to_hbm [thread:$0]  (%p3567_p11), %s4544_s18, 2048, %s4542_s15, %s2365_s13, %s3425_s17, %s3425_s17, %s3426_s8  }
 0x494 PF: > { %s4759_s11 = sld [smem:[#allocation22_spill]]  ;;  %s4760_s24 = sld [smem:[#allocation24_spill]] }
 0x495   : > { %p2924_p3 = scmp.ge.s32.totalorder %s3410_s28, 2 }
 0x49a   : > { %s2396_s25 = sand.u32 1, %s4759_s11   ;;  %p4761_p7 = scmp.ne.s32.totalorder %s4760_s24, 0 }
 0x49b   : > { %s2397_s19 = scalar_lea.sflag [#allocation7], %s2396_s25 }
 0x49c   : > { %p2918_p1 = pnand %p2924_p3, %p4761_p7 }
 0x49e   : > { %3377 = dma.done.wait (!%p2918_p1), %s2397_s19, 2048  }
 0x49f   : > { %3379 = vsyncadd (!%p2918_p1), %s2397_s19, 4294965248  ;;  %s23_s28 = sadd.s32 1, %s3410_s28   ;;  %s4762_s24 = sld [smem:[#allocation23_spill]] }
 0x4a0   : > { %p20_p2 = scmp.ge.s32.totalorder %s23_s28, 6   ;;  %s4763_s26 = sld [smem:[#allocation25_spill]] }
 0x4a1   : > { %s4764_s18 = sld [smem:[#allocation27_spill]]  ;;  %s4765_s21 = smov %s3386_s22 }
 0x4a2   : > { %s4766_s22 = smov %s3390_s23  ;;  %s4767_s23 = smov %s3584_s10 }
 0x4a3   : > { %s4768_s25 = smov %s3406_s27  ;;  %22 = sbr.rel (!%p20_p2) target bundleno = 11 (0xb), region = 102 }
 0x4a7   : > { %s4769_s27 = smov %s4764_s18 }
 0x4aa   :  { %2402 = vsyncpa [#allocation6], 1 }
 0x4ab   :  { %2404 = vsyncpa [#allocation6 + $0x1], 1 }
 0x4ac   :  { %2405 = vsyncpa [#allocation9], 1 }
 0x4ad   :  { %2406 = vsyncpa [#allocation7], 1 }
 0x4ae   :  { %2408 = vsyncpa [#allocation7 + $0x1], 1 }
 0x4af   :  { %2409 = vsyncmov [#allocation4] }
 0x4b2   :  { %s2410_s14 = vpop.sfrf %2409 }
 0x4b3   :  { %p2647_p11 = scmp.ne.s32.totalorder %s2410_s14, 0 }
 0x4b5   :  { %2414 = shalt.err (%p2647_p11)  }
 0x4b6   :  { %2416 = vsyncmov [#allocation4 + $0x1] }
 0x4b9   :  { %s2417_s10 = vpop.sfrf %2416 }
 0x4ba   :  { %p2648_p4 = scmp.ne.s32.totalorder %s2417_s10, 0 }
 0x4bc   :  { %2421 = shalt.err (%p2648_p4)  }

</bundles_post_ra>
